<compile_context>
chip_gen: v5e
topology: v5e:2x2
jax: 0.10.0
libtpu: 0.0.40
codegen_flags: <defaults>
</compile_context>

<pallas_src>
import functools

import jax
import jax.numpy as jnp
from jax import lax
from jax.experimental import pallas as pl
from jax.experimental.pallas import tpu as pltpu

_EPS = 1e-5
_K = 4          # Chebyshev order
_F_PAD = 128    # lane-padded feature width of the 3-branch activation slab


# ----------------------------------------------------------------------------
# Fused kernel: 4x (ChebConv + GraphNorm + activation) + residual + mean-pool
# + fused heads + per-branch softmax, one grid step per graph.
# ----------------------------------------------------------------------------
def _fused_kernel(l_ref, x_ref, w_ref, vec_ref, wh_ref, o_ref, *,
                  out_feats, num_branches, num_layers):
    L = l_ref[0]                                  # [N, N]
    n = L.shape[0]
    f = x_ref.shape[2]                            # _F_PAD
    inv_n = 1.0 / n

    # Monomial basis [L; L^2; L^3], built once per graph.  The Chebyshev
    # T0..T3 combination is folded into the host-packed weights (no eye()).
    l2 = jnp.dot(L, L, preferred_element_type=jnp.float32)
    l3 = jnp.dot(L, l2, preferred_element_type=jnp.float32)
    basis = jnp.concatenate([L, l2, l3], axis=0)             # [3N, N]

    def vrow(r):                                             # [1, F_PAD]
        return vec_ref[r:r + 1, :]

    def cheb(x, li):
        # One stacked-K matmul per layer: blocks are 128-lane aligned.
        px = jnp.dot(basis, x, preferred_element_type=jnp.float32)     # [3N, F]
        a = jnp.concatenate(
            [x, px[0:n], px[n:2 * n], px[2 * n:3 * n]], axis=1)        # [N, 4F]
        return (jnp.dot(a, w_ref[li], preferred_element_type=jnp.float32)
                + vrow(4 * li + 0))

    def gnorm(y, li):
        g, be, ms = vrow(4 * li + 1), vrow(4 * li + 2), vrow(4 * li + 3)
        # Two independent reductions; var via E[x^2] - ms(2-ms)mean^2.
        mean = jnp.sum(y, axis=0, keepdims=True) * inv_n
        ex2 = jnp.sum(y * y, axis=0, keepdims=True) * inv_n
        var = jnp.maximum(ex2 - ms * (2.0 - ms) * (mean * mean), 0.0)
        return g * (y - ms * mean) * lax.rsqrt(var + _EPS) + be

    x0 = x_ref[0]                                            # [N, F]
    x = x0
    for li in range(num_layers - 1):          # layers 0..2: conv->norm->leaky
        y = gnorm(cheb(x, li), li)
        x = jnp.where(y > 0.0, y, 0.1 * y)
    y = gnorm(cheb(x, num_layers - 1), num_layers - 1)       # last layer
    x = jnp.maximum(x0 + y, 0.0)                             # residual + ReLU

    # Heads: mean pool -> ReLU -> fused block-diag linear -> per-branch softmax.
    pooled = jnp.maximum(jnp.sum(x, axis=0, keepdims=True) * inv_n, 0.0)
    logits = (jnp.dot(pooled, wh_ref[...], preferred_element_type=jnp.float32)
              + vrow(4 * num_layers))                        # [1, F]

    c = out_feats
    lane = lax.broadcasted_iota(jnp.int32, (1, f), 1)
    res = jnp.zeros_like(logits)
    for j in range(num_branches):             # masked lane sums, per-branch max
        m = (lane >= j * c) & (lane < (j + 1) * c)
        mj = jnp.max(jnp.where(m, logits, -jnp.inf), axis=-1, keepdims=True)
        e = jnp.where(m, jnp.exp(logits - mj), 0.0)
        res = res + e / jnp.sum(e, axis=-1, keepdims=True)
    o_ref[...] = res[None, :, :num_branches * c]             # [1, 1, B*C]


def _fused_call(l_b, x0_b, packed, *, out_feats, num_branches):
    """Batched forward: l_b [G,N,N], x0_b [G,N,F_PAD] -> [G, num_branches, C]."""
    g, n, f = x0_b.shape
    num_layers = packed["w_all"].shape[0]
    bc = num_branches * out_feats
    kern = functools.partial(_fused_kernel, out_feats=out_feats,
                             num_branches=num_branches, num_layers=num_layers)
    out = pl.pallas_call(
        kern,
        out_shape=jax.ShapeDtypeStruct((g, 1, bc), jnp.float32),
        grid_spec=pltpu.PrefetchScalarGridSpec(
            num_scalar_prefetch=0,
            grid=(g,),
            in_specs=[
                pl.BlockSpec((1, n, n), lambda i: (i, 0, 0)),       # per-graph L
                pl.BlockSpec((1, n, f), lambda i: (i, 0, 0)),       # per-graph x0
                # weights/params: constant index_map -> DMA'd once, VMEM-resident
                pl.BlockSpec(packed["w_all"].shape, lambda i: (0, 0, 0)),
                pl.BlockSpec(packed["vecs"].shape, lambda i: (0, 0)),
                pl.BlockSpec(packed["w_head"].shape, lambda i: (0, 0)),
            ],
            out_specs=pl.BlockSpec((1, 1, bc), lambda i: (i, 0, 0)),
        ),
        compiler_params=pltpu.CompilerParams(
            dimension_semantics=("parallel",)),   # v7x: graphs split across TCs
    )(l_b, x0_b, packed["w_all"], packed["vecs"], packed["w_head"])
    return out.reshape(g, num_branches, out_feats)


# ----------------------------------------------------------------------------
# Host-side parameter packing (done once).
# ----------------------------------------------------------------------------
def _monomial_weights(w):
    """Fold the K=4 Chebyshev combination into monomial (I,L,L^2,L^3) weights."""
    return jnp.stack([w[0] - w[2], w[1] - 3.0 * w[3],
                      2.0 * w[2], 4.0 * w[3]], axis=0)


def pack_params(branch_params):
    """Block-diag branch packing + lane padding; 3 packed parameter arrays."""
    num_layers = len(branch_params[0]["conv"])
    w_layers, vec_rows = [], []
    for li in range(num_layers):
        big = jnp.zeros((_K, _F_PAD, _F_PAD), jnp.float32)
        bias, gamma, beta, ms = (jnp.zeros((_F_PAD,), jnp.float32)
                                 for _ in range(4))
        in_off = out_off = 0
        for p in branch_params:
            w, b = p["conv"][li]
            g, be, m = p["gn"][li]
            fin, fout = w.shape[1], w.shape[2]
            big = big.at[:, in_off:in_off + fin,
                         out_off:out_off + fout].set(_monomial_weights(w))
            bias = bias.at[out_off:out_off + fout].set(b)
            gamma = gamma.at[out_off:out_off + fout].set(g)
            beta = beta.at[out_off:out_off + fout].set(be)
            ms = ms.at[out_off:out_off + fout].set(m)
            in_off += fin
            out_off += fout
        w_layers.append(big.reshape(_K * _F_PAD, _F_PAD))
        vec_rows.extend([bias, gamma, beta, ms])

    c = branch_params[0]["lin"][0].shape[1]
    w_head = jnp.zeros((_F_PAD, _F_PAD), jnp.float32)
    b_head = jnp.zeros((_F_PAD,), jnp.float32)
    in_off = 0
    for j, p in enumerate(branch_params):
        lw, lb = p["lin"]
        w_head = w_head.at[in_off:in_off + lw.shape[0], j * c:(j + 1) * c].set(lw)
        b_head = b_head.at[j * c:(j + 1) * c].set(lb)
        in_off += lw.shape[0]
    vec_rows.append(b_head)

    n_rows = ((len(vec_rows) + 7) // 8) * 8          # pad rows to sublane mult
    vecs = jnp.zeros((n_rows, _F_PAD), jnp.float32)
    vecs = vecs.at[:len(vec_rows), :].set(jnp.stack(vec_rows, axis=0))
    return {"w_all": jnp.stack(w_layers, axis=0),    # [layers, 512, 128]
            "vecs": vecs,                            # [24, 128]
            "w_head": w_head}                        # [128, 128]


# ----------------------------------------------------------------------------
# Glue: dense scaled Laplacian, parameter init, forward wrappers.
# ----------------------------------------------------------------------------
def dense_cheb_laplacian(edge_index, num_nodes):
    """PyG ChebConv 'sym' norm, lambda_max=2  ->  L_hat = -D^-1/2 A D^-1/2."""
    # TODO(synk): the scatter-add densification stays in plain XLA (dynamic
    # scatter has no worthwhile Pallas equivalent at this size); degree is the
    # in-degree, which matches PyG only for undirected edge_index.
    src, dst = edge_index[0], edge_index[1]
    a = jnp.zeros((num_nodes, num_nodes), jnp.float32).at[dst, src].add(1.0)
    a = a * (1.0 - jnp.eye(num_nodes, dtype=jnp.float32))    # drop self loops
    deg = jnp.sum(a, axis=1)
    d_inv_sqrt = jnp.where(deg > 0.0,
                           1.0 / jnp.sqrt(jnp.maximum(deg, 1e-12)), 0.0)
    return -(d_inv_sqrt[:, None] * a * d_inv_sqrt[None, :])


def init_cheb(key, fin, fout):
    k1, k2 = jax.random.split(key)
    w = jax.random.normal(k1, (_K, fin, fout), jnp.float32) / jnp.sqrt(float(fin))
    b = 0.01 * jax.random.normal(k2, (fout,), jnp.float32)
    return w, b


def init_graphnorm(f):
    return (jnp.ones((f,), jnp.float32),    # weight
            jnp.zeros((f,), jnp.float32),   # bias
            jnp.ones((f,), jnp.float32))    # mean_scale


def init_branch(key, hidden_feats, out_feats):
    dims = list(hidden_feats)
    conv_dims = [(dims[i], dims[i + 1]) for i in range(len(dims) - 1)]
    conv_dims.append((dims[-1], dims[0]))
    keys = jax.random.split(key, len(conv_dims) + 1)
    convs = [init_cheb(keys[i], fi, fo) for i, (fi, fo) in enumerate(conv_dims)]
    gns = [init_graphnorm(fo) for (_, fo) in conv_dims]
    k1, k2 = jax.random.split(keys[-1])
    lw = jax.random.normal(k1, (dims[0], out_feats), jnp.float32) / jnp.sqrt(float(dims[0]))
    lb = 0.01 * jax.random.normal(k2, (out_feats,), jnp.float32)
    return {"conv": convs, "gn": gns, "lin": (lw, lb)}


def _pad_slab(feat, feat_1, feat_2):
    x0 = jnp.concatenate([feat, feat_1, feat_2], axis=1)     # [N, 56]
    return jnp.pad(x0, ((0, 0), (0, _F_PAD - x0.shape[1])))  # [N, 128]


def cheb_gcn3_multi_softmax(edge_index, feat, feat_1, feat_2, packed,
                            num_nodes, out_feats):
    """Single-graph forward (matches the PyTorch module)."""
    l_hat = dense_cheb_laplacian(edge_index, num_nodes)
    x0 = _pad_slab(feat, feat_1, feat_2)
    out = _fused_call(l_hat[None], x0[None], packed,
                      out_feats=out_feats, num_branches=3)   # [1, 3, C]
    return out[0, 0], out[0, 1], out[0, 2]


# ----------------------------------------------------------------------------
# Pure-JAX per-branch reference (correctness check only; no Pallas).
# ----------------------------------------------------------------------------
def _branch_reference(l_hat, x, params):
    hp = lax.Precision.HIGHEST

    def cheb(h, w, b):
        t0 = h
        t1 = jnp.dot(l_hat, t0, precision=hp)
        t2 = 2.0 * jnp.dot(l_hat, t1, precision=hp) - t0
        t3 = 2.0 * jnp.dot(l_hat, t2, precision=hp) - t1
        return (jnp.dot(t0, w[0], precision=hp) + jnp.dot(t1, w[1], precision=hp)
                + jnp.dot(t2, w[2], precision=hp) + jnp.dot(t3, w[3], precision=hp)
                + b)

    def gnorm(h, g, be, ms):
        mean = jnp.mean(h, axis=0, keepdims=True)
        cen = h - mean * ms
        var = jnp.mean(cen * cen, axis=0, keepdims=True)
        return g * cen * lax.rsqrt(var + _EPS) + be

    h = x
    for i in range(3):
        w, b = params["conv"][i]
        g, be, ms = params["gn"][i]
        y = gnorm(cheb(h, w, b), g, be, ms)
        h = jnp.where(y > 0.0, y, 0.1 * y)
    w, b = params["conv"][3]
    g, be, ms = params["gn"][3]
    h = jnp.maximum(x + gnorm(cheb(h, w, b), g, be, ms), 0.0)
    pooled = jnp.maximum(jnp.mean(h, axis=0), 0.0)
    lw, lb = params["lin"]
    return jax.nn.softmax(jnp.dot(pooled, lw, precision=hp) + lb)


# ----------------------------------------------------------------------------
if __name__ == "__main__":
    key = jax.random.PRNGKey(0)

    N = 16                    # graph nodes (single graph; batch = zeros)
    hidden_feats = [32, 16, 16, 16]
    hidden_feats2 = [16, 16, 16, 16]
    hidden_feats3 = [8, 16, 16, 16]
    out_feats = 4

    k_feat, k_feat1, k_feat2, k_b1, k_b2, k_b3 = jax.random.split(key, 6)
    feat = jax.random.normal(k_feat, (N, hidden_feats[0]), jnp.float32)
    feat_1 = jax.random.normal(k_feat1, (N, hidden_feats2[0]), jnp.float32)
    feat_2 = jax.random.normal(k_feat2, (N, hidden_feats3[0]), jnp.float32)

    # undirected ring graph, both directions
    src = jnp.arange(N, dtype=jnp.int32)
    dst = (src + 1) % N
    edge_index = jnp.stack(
        [jnp.concatenate([src, dst]), jnp.concatenate([dst, src])], axis=0)

    branch_params = [
        init_branch(k_b1, hidden_feats, out_feats),
        init_branch(k_b2, hidden_feats2, out_feats),
        init_branch(k_b3, hidden_feats3, out_feats),
    ]
    packed = pack_params(branch_params)   # monomial + block-diag packing, once

    fwd = jax.jit(cheb_gcn3_multi_softmax,
                  static_argnames=("num_nodes", "out_feats"))
    out1, out2, out3 = fwd(edge_index, feat, feat_1, feat_2, packed,
                           num_nodes=N, out_feats=out_feats)
    jax.block_until_ready((out1, out2, out3))

    assert out1.shape == (out_feats,)
    assert out2.shape == (out_feats,)
    assert out3.shape == (out_feats,)

    # correctness vs pure-JAX per-branch reference
    l_hat = dense_cheb_laplacian(edge_index, N)
    refs = [_branch_reference(l_hat, f, p)
            for f, p in zip((feat, feat_1, feat_2), branch_params)]
    for got, ref in zip((out1, out2, out3), refs):
        assert jnp.allclose(got, ref, atol=2e-3, rtol=2e-3), (got, ref)

    # batched path: G=2 graphs over the parallel grid axis (exercises the grid;
    # on v7x the two graphs land on the two TensorCores).
    kb = jax.random.split(jax.random.PRNGKey(1), 3)
    featB = jax.random.normal(kb[0], (N, hidden_feats[0]), jnp.float32)
    feat1B = jax.random.normal(kb[1], (N, hidden_feats2[0]), jnp.float32)
    feat2B = jax.random.normal(kb[2], (N, hidden_feats3[0]), jnp.float32)
    l_b = jnp.stack([l_hat, l_hat], axis=0)
    x0_b = jnp.stack([_pad_slab(feat, feat_1, feat_2),
                      _pad_slab(featB, feat1B, feat2B)], axis=0)
    batched = jax.jit(functools.partial(_fused_call, out_feats=out_feats,
                                        num_branches=3))
    out_b = batched(l_b, x0_b, packed)
    jax.block_until_ready(out_b)
    refsB = [_branch_reference(l_hat, f, p)
             for f, p in zip((featB, feat1B, feat2B), branch_params)]
    for j in range(3):
        assert jnp.allclose(out_b[0, j], refs[j], atol=2e-3, rtol=2e-3)
        assert jnp.allclose(out_b[1, j], refsB[j], atol=2e-3, rtol=2e-3)

    print("KERNEL_OK")
</pallas_src>

<mosaic_0001>
module attributes {stable_mosaic.version = 11 : i64} {
  func.func @_fused_kernel(%arg0: i32, %arg1: memref<1x16x16xf32, #tpu.memory_space<vmem>>, %arg2: memref<1x16x128xf32, #tpu.memory_space<vmem>>, %arg3: memref<4x512x128xf32, #tpu.memory_space<vmem>>, %arg4: memref<24x128xf32, #tpu.memory_space<vmem>>, %arg5: memref<128x128xf32, #tpu.memory_space<vmem>>, %arg6: memref<1x1x12xf32, #tpu.memory_space<vmem>>) attributes {dimension_semantics = [#tpu.dimension_semantics<parallel>], iteration_bounds = array<i64: 1>, scalar_prefetch = 0 : i64, scratch_operands = 0 : i64, tpu.core_type = #tpu.core_type<tc>, window_params = [{transform_indices = @transform_0, window_bounds = array<i64: 1, 16, 16>}, {transform_indices = @transform_1, window_bounds = array<i64: 1, 16, 128>}, {pipeline_mode = #tpu.pipeline_mode<synchronous>, transform_indices = @transform_2, window_bounds = array<i64: 4, 512, 128>}, {pipeline_mode = #tpu.pipeline_mode<synchronous>, transform_indices = @transform_3, window_bounds = array<i64: 24, 128>}, {pipeline_mode = #tpu.pipeline_mode<synchronous>, transform_indices = @transform_4, window_bounds = array<i64: 128, 128>}, {transform_indices = @transform_5, window_bounds = array<i64: 1, 1, 12>}]} {
    %c0 = arith.constant 0 : index
    %c0_0 = arith.constant 0 : index
    %c0_1 = arith.constant 0 : index
    %0 = vector.load %arg1[%c0, %c0_0, %c0_1] : memref<1x16x16xf32, #tpu.memory_space<vmem>>, vector<1x16x16xf32>
    %1 = vector.shape_cast %0 : vector<1x16x16xf32> to vector<16x16xf32>
    %cst = arith.constant dense<0.000000e+00> : vector<16x16xf32>
    %2 = tpu.matmul %1, %1, %cst {dimension_numbers = #tpu.dot_dimension_numbers<[1], [0], [0], [1], [0, 0, 1, 1], [], []>} : vector<16x16xf32>, vector<16x16xf32>, vector<16x16xf32> -> vector<16x16xf32>
    %cst_2 = arith.constant dense<0.000000e+00> : vector<16x16xf32>
    %3 = tpu.matmul %1, %2, %cst_2 {dimension_numbers = #tpu.dot_dimension_numbers<[1], [0], [0], [1], [0, 0, 1, 1], [], []>} : vector<16x16xf32>, vector<16x16xf32>, vector<16x16xf32> -> vector<16x16xf32>
    %4 = tpu.concatenate %1, %2, %3 in 0 : vector<16x16xf32>, vector<16x16xf32>, vector<16x16xf32> -> vector<48x16xf32>
    %c0_3 = arith.constant 0 : index
    %c0_4 = arith.constant 0 : index
    %c0_5 = arith.constant 0 : index
    %5 = vector.load %arg2[%c0_3, %c0_4, %c0_5] : memref<1x16x128xf32, #tpu.memory_space<vmem>>, vector<1x16x128xf32>
    %6 = vector.shape_cast %5 : vector<1x16x128xf32> to vector<16x128xf32>
    %cst_6 = arith.constant dense<0.000000e+00> : vector<48x128xf32>
    %7 = tpu.matmul %4, %6, %cst_6 {dimension_numbers = #tpu.dot_dimension_numbers<[1], [0], [0], [1], [0, 0, 1, 1], [], []>} : vector<48x16xf32>, vector<16x128xf32>, vector<48x128xf32> -> vector<48x128xf32>
    %8 = vector.extract_strided_slice %7 {offsets = [0, 0], sizes = [16, 128], strides = [1, 1]} : vector<48x128xf32> to vector<16x128xf32>
    %9 = vector.extract_strided_slice %7 {offsets = [16, 0], sizes = [16, 128], strides = [1, 1]} : vector<48x128xf32> to vector<16x128xf32>
    %10 = vector.extract_strided_slice %7 {offsets = [32, 0], sizes = [16, 128], strides = [1, 1]} : vector<48x128xf32> to vector<16x128xf32>
    %11 = tpu.concatenate %6, %8, %9, %10 in 1 : vector<16x128xf32>, vector<16x128xf32>, vector<16x128xf32>, vector<16x128xf32> -> vector<16x512xf32>
    %c0_7 = arith.constant 0 : index
    %c0_8 = arith.constant 0 : index
    %c0_9 = arith.constant 0 : index
    %12 = vector.load %arg3[%c0_7, %c0_8, %c0_9] : memref<4x512x128xf32, #tpu.memory_space<vmem>>, vector<1x512x128xf32>
    %13 = vector.shape_cast %12 : vector<1x512x128xf32> to vector<512x128xf32>
    %cst_10 = arith.constant dense<0.000000e+00> : vector<16x128xf32>
    %14 = tpu.matmul %11, %13, %cst_10 {dimension_numbers = #tpu.dot_dimension_numbers<[1], [0], [0], [1], [0, 0, 1, 1], [], []>} : vector<16x512xf32>, vector<512x128xf32>, vector<16x128xf32> -> vector<16x128xf32>
    %c0_11 = arith.constant 0 : index
    %c0_12 = arith.constant 0 : index
    %15 = vector.load %arg4[%c0_11, %c0_12] : memref<24x128xf32, #tpu.memory_space<vmem>>, vector<1x128xf32>
    %16 = vector.broadcast %15 : vector<1x128xf32> to vector<16x128xf32>
    %17 = arith.addf %14, %16 : vector<16x128xf32>
    %c1 = arith.constant 1 : index
    %c0_13 = arith.constant 0 : index
    %18 = vector.load %arg4[%c1, %c0_13] : memref<24x128xf32, #tpu.memory_space<vmem>>, vector<1x128xf32>
    %c2 = arith.constant 2 : index
    %c0_14 = arith.constant 0 : index
    %19 = vector.load %arg4[%c2, %c0_14] : memref<24x128xf32, #tpu.memory_space<vmem>>, vector<1x128xf32>
    %c3 = arith.constant 3 : index
    %c0_15 = arith.constant 0 : index
    %20 = vector.load %arg4[%c3, %c0_15] : memref<24x128xf32, #tpu.memory_space<vmem>>, vector<1x128xf32>
    %cst_16 = arith.constant dense<0.000000e+00> : vector<128xf32>
    %21 = vector.multi_reduction <add>, %17, %cst_16 [0] : vector<16x128xf32> to vector<128xf32>
    %22 = vector.shape_cast %21 : vector<128xf32> to vector<1x128xf32>
    %cst_17 = arith.constant 6.250000e-02 : f32
    %23 = vector.broadcast %cst_17 : f32 to vector<1x128xf32>
    %24 = arith.mulf %22, %23 : vector<1x128xf32>
    %25 = arith.mulf %17, %17 : vector<16x128xf32>
    %cst_18 = arith.constant dense<0.000000e+00> : vector<128xf32>
    %26 = vector.multi_reduction <add>, %25, %cst_18 [0] : vector<16x128xf32> to vector<128xf32>
    %27 = vector.shape_cast %26 : vector<128xf32> to vector<1x128xf32>
    %cst_19 = arith.constant 6.250000e-02 : f32
    %28 = vector.broadcast %cst_19 : f32 to vector<1x128xf32>
    %29 = arith.mulf %27, %28 : vector<1x128xf32>
    %cst_20 = arith.constant 2.000000e+00 : f32
    %30 = vector.broadcast %cst_20 : f32 to vector<1x128xf32>
    %31 = arith.subf %30, %20 : vector<1x128xf32>
    %32 = arith.mulf %20, %31 : vector<1x128xf32>
    %33 = arith.mulf %24, %24 : vector<1x128xf32>
    %34 = arith.mulf %32, %33 : vector<1x128xf32>
    %35 = arith.subf %29, %34 : vector<1x128xf32>
    %cst_21 = arith.constant 0.000000e+00 : f32
    %36 = vector.broadcast %cst_21 : f32 to vector<1x128xf32>
    %37 = arith.maximumf %35, %36 : vector<1x128xf32>
    %38 = arith.mulf %20, %24 : vector<1x128xf32>
    %39 = vector.broadcast %38 : vector<1x128xf32> to vector<16x128xf32>
    %40 = arith.subf %17, %39 : vector<16x128xf32>
    %41 = vector.broadcast %18 : vector<1x128xf32> to vector<16x128xf32>
    %42 = arith.mulf %41, %40 : vector<16x128xf32>
    %cst_22 = arith.constant 9.99999974E-6 : f32
    %43 = vector.broadcast %cst_22 : f32 to vector<1x128xf32>
    %44 = arith.addf %37, %43 : vector<1x128xf32>
    %45 = math.rsqrt %44 : vector<1x128xf32>
    %46 = vector.broadcast %45 : vector<1x128xf32> to vector<16x128xf32>
    %47 = arith.mulf %42, %46 : vector<16x128xf32>
    %48 = vector.broadcast %19 : vector<1x128xf32> to vector<16x128xf32>
    %49 = arith.addf %47, %48 : vector<16x128xf32>
    %cst_23 = arith.constant 0.000000e+00 : f32
    %50 = vector.broadcast %cst_23 : f32 to vector<16x128xf32>
    %51 = arith.cmpf ogt, %49, %50 : vector<16x128xf32>
    %cst_24 = arith.constant 1.000000e-01 : f32
    %52 = vector.broadcast %cst_24 : f32 to vector<16x128xf32>
    %53 = arith.mulf %52, %49 : vector<16x128xf32>
    %54 = arith.select %51, %49, %53 : vector<16x128xi1>, vector<16x128xf32>
    %cst_25 = arith.constant dense<0.000000e+00> : vector<48x128xf32>
    %55 = tpu.matmul %4, %54, %cst_25 {dimension_numbers = #tpu.dot_dimension_numbers<[1], [0], [0], [1], [0, 0, 1, 1], [], []>} : vector<48x16xf32>, vector<16x128xf32>, vector<48x128xf32> -> vector<48x128xf32>
    %56 = vector.extract_strided_slice %55 {offsets = [0, 0], sizes = [16, 128], strides = [1, 1]} : vector<48x128xf32> to vector<16x128xf32>
    %57 = vector.extract_strided_slice %55 {offsets = [16, 0], sizes = [16, 128], strides = [1, 1]} : vector<48x128xf32> to vector<16x128xf32>
    %58 = vector.extract_strided_slice %55 {offsets = [32, 0], sizes = [16, 128], strides = [1, 1]} : vector<48x128xf32> to vector<16x128xf32>
    %59 = tpu.concatenate %54, %56, %57, %58 in 1 : vector<16x128xf32>, vector<16x128xf32>, vector<16x128xf32>, vector<16x128xf32> -> vector<16x512xf32>
    %c1_26 = arith.constant 1 : index
    %c0_27 = arith.constant 0 : index
    %c0_28 = arith.constant 0 : index
    %60 = vector.load %arg3[%c1_26, %c0_27, %c0_28] : memref<4x512x128xf32, #tpu.memory_space<vmem>>, vector<1x512x128xf32>
    %61 = vector.shape_cast %60 : vector<1x512x128xf32> to vector<512x128xf32>
    %cst_29 = arith.constant dense<0.000000e+00> : vector<16x128xf32>
    %62 = tpu.matmul %59, %61, %cst_29 {dimension_numbers = #tpu.dot_dimension_numbers<[1], [0], [0], [1], [0, 0, 1, 1], [], []>} : vector<16x512xf32>, vector<512x128xf32>, vector<16x128xf32> -> vector<16x128xf32>
    %c4 = arith.constant 4 : index
    %c0_30 = arith.constant 0 : index
    %63 = vector.load %arg4[%c4, %c0_30] : memref<24x128xf32, #tpu.memory_space<vmem>>, vector<1x128xf32>
    %64 = vector.broadcast %63 : vector<1x128xf32> to vector<16x128xf32>
    %65 = arith.addf %62, %64 : vector<16x128xf32>
    %c5 = arith.constant 5 : index
    %c0_31 = arith.constant 0 : index
    %66 = vector.load %arg4[%c5, %c0_31] : memref<24x128xf32, #tpu.memory_space<vmem>>, vector<1x128xf32>
    %c6 = arith.constant 6 : index
    %c0_32 = arith.constant 0 : index
    %67 = vector.load %arg4[%c6, %c0_32] : memref<24x128xf32, #tpu.memory_space<vmem>>, vector<1x128xf32>
    %c7 = arith.constant 7 : index
    %c0_33 = arith.constant 0 : index
    %68 = vector.load %arg4[%c7, %c0_33] : memref<24x128xf32, #tpu.memory_space<vmem>>, vector<1x128xf32>
    %cst_34 = arith.constant dense<0.000000e+00> : vector<128xf32>
    %69 = vector.multi_reduction <add>, %65, %cst_34 [0] : vector<16x128xf32> to vector<128xf32>
    %70 = vector.shape_cast %69 : vector<128xf32> to vector<1x128xf32>
    %cst_35 = arith.constant 6.250000e-02 : f32
    %71 = vector.broadcast %cst_35 : f32 to vector<1x128xf32>
    %72 = arith.mulf %70, %71 : vector<1x128xf32>
    %73 = arith.mulf %65, %65 : vector<16x128xf32>
    %cst_36 = arith.constant dense<0.000000e+00> : vector<128xf32>
    %74 = vector.multi_reduction <add>, %73, %cst_36 [0] : vector<16x128xf32> to vector<128xf32>
    %75 = vector.shape_cast %74 : vector<128xf32> to vector<1x128xf32>
    %cst_37 = arith.constant 6.250000e-02 : f32
    %76 = vector.broadcast %cst_37 : f32 to vector<1x128xf32>
    %77 = arith.mulf %75, %76 : vector<1x128xf32>
    %cst_38 = arith.constant 2.000000e+00 : f32
    %78 = vector.broadcast %cst_38 : f32 to vector<1x128xf32>
    %79 = arith.subf %78, %68 : vector<1x128xf32>
    %80 = arith.mulf %68, %79 : vector<1x128xf32>
    %81 = arith.mulf %72, %72 : vector<1x128xf32>
    %82 = arith.mulf %80, %81 : vector<1x128xf32>
    %83 = arith.subf %77, %82 : vector<1x128xf32>
    %cst_39 = arith.constant 0.000000e+00 : f32
    %84 = vector.broadcast %cst_39 : f32 to vector<1x128xf32>
    %85 = arith.maximumf %83, %84 : vector<1x128xf32>
    %86 = arith.mulf %68, %72 : vector<1x128xf32>
    %87 = vector.broadcast %86 : vector<1x128xf32> to vector<16x128xf32>
    %88 = arith.subf %65, %87 : vector<16x128xf32>
    %89 = vector.broadcast %66 : vector<1x128xf32> to vector<16x128xf32>
    %90 = arith.mulf %89, %88 : vector<16x128xf32>
    %cst_40 = arith.constant 9.99999974E-6 : f32
    %91 = vector.broadcast %cst_40 : f32 to vector<1x128xf32>
    %92 = arith.addf %85, %91 : vector<1x128xf32>
    %93 = math.rsqrt %92 : vector<1x128xf32>
    %94 = vector.broadcast %93 : vector<1x128xf32> to vector<16x128xf32>
    %95 = arith.mulf %90, %94 : vector<16x128xf32>
    %96 = vector.broadcast %67 : vector<1x128xf32> to vector<16x128xf32>
    %97 = arith.addf %95, %96 : vector<16x128xf32>
    %cst_41 = arith.constant 0.000000e+00 : f32
    %98 = vector.broadcast %cst_41 : f32 to vector<16x128xf32>
    %99 = arith.cmpf ogt, %97, %98 : vector<16x128xf32>
    %cst_42 = arith.constant 1.000000e-01 : f32
    %100 = vector.broadcast %cst_42 : f32 to vector<16x128xf32>
    %101 = arith.mulf %100, %97 : vector<16x128xf32>
    %102 = arith.select %99, %97, %101 : vector<16x128xi1>, vector<16x128xf32>
    %cst_43 = arith.constant dense<0.000000e+00> : vector<48x128xf32>
    %103 = tpu.matmul %4, %102, %cst_43 {dimension_numbers = #tpu.dot_dimension_numbers<[1], [0], [0], [1], [0, 0, 1, 1], [], []>} : vector<48x16xf32>, vector<16x128xf32>, vector<48x128xf32> -> vector<48x128xf32>
    %104 = vector.extract_strided_slice %103 {offsets = [0, 0], sizes = [16, 128], strides = [1, 1]} : vector<48x128xf32> to vector<16x128xf32>
    %105 = vector.extract_strided_slice %103 {offsets = [16, 0], sizes = [16, 128], strides = [1, 1]} : vector<48x128xf32> to vector<16x128xf32>
    %106 = vector.extract_strided_slice %103 {offsets = [32, 0], sizes = [16, 128], strides = [1, 1]} : vector<48x128xf32> to vector<16x128xf32>
    %107 = tpu.concatenate %102, %104, %105, %106 in 1 : vector<16x128xf32>, vector<16x128xf32>, vector<16x128xf32>, vector<16x128xf32> -> vector<16x512xf32>
    %c2_44 = arith.constant 2 : index
    %c0_45 = arith.constant 0 : index
    %c0_46 = arith.constant 0 : index
    %108 = vector.load %arg3[%c2_44, %c0_45, %c0_46] : memref<4x512x128xf32, #tpu.memory_space<vmem>>, vector<1x512x128xf32>
    %109 = vector.shape_cast %108 : vector<1x512x128xf32> to vector<512x128xf32>
    %cst_47 = arith.constant dense<0.000000e+00> : vector<16x128xf32>
    %110 = tpu.matmul %107, %109, %cst_47 {dimension_numbers = #tpu.dot_dimension_numbers<[1], [0], [0], [1], [0, 0, 1, 1], [], []>} : vector<16x512xf32>, vector<512x128xf32>, vector<16x128xf32> -> vector<16x128xf32>
    %c8 = arith.constant 8 : index
    %c0_48 = arith.constant 0 : index
    %111 = vector.load %arg4[%c8, %c0_48] : memref<24x128xf32, #tpu.memory_space<vmem>>, vector<1x128xf32>
    %112 = vector.broadcast %111 : vector<1x128xf32> to vector<16x128xf32>
    %113 = arith.addf %110, %112 : vector<16x128xf32>
    %c9 = arith.constant 9 : index
    %c0_49 = arith.constant 0 : index
    %114 = vector.load %arg4[%c9, %c0_49] : memref<24x128xf32, #tpu.memory_space<vmem>>, vector<1x128xf32>
    %c10 = arith.constant 10 : index
    %c0_50 = arith.constant 0 : index
    %115 = vector.load %arg4[%c10, %c0_50] : memref<24x128xf32, #tpu.memory_space<vmem>>, vector<1x128xf32>
    %c11 = arith.constant 11 : index
    %c0_51 = arith.constant 0 : index
    %116 = vector.load %arg4[%c11, %c0_51] : memref<24x128xf32, #tpu.memory_space<vmem>>, vector<1x128xf32>
    %cst_52 = arith.constant dense<0.000000e+00> : vector<128xf32>
    %117 = vector.multi_reduction <add>, %113, %cst_52 [0] : vector<16x128xf32> to vector<128xf32>
    %118 = vector.shape_cast %117 : vector<128xf32> to vector<1x128xf32>
    %cst_53 = arith.constant 6.250000e-02 : f32
    %119 = vector.broadcast %cst_53 : f32 to vector<1x128xf32>
    %120 = arith.mulf %118, %119 : vector<1x128xf32>
    %121 = arith.mulf %113, %113 : vector<16x128xf32>
    %cst_54 = arith.constant dense<0.000000e+00> : vector<128xf32>
    %122 = vector.multi_reduction <add>, %121, %cst_54 [0] : vector<16x128xf32> to vector<128xf32>
    %123 = vector.shape_cast %122 : vector<128xf32> to vector<1x128xf32>
    %cst_55 = arith.constant 6.250000e-02 : f32
    %124 = vector.broadcast %cst_55 : f32 to vector<1x128xf32>
    %125 = arith.mulf %123, %124 : vector<1x128xf32>
    %cst_56 = arith.constant 2.000000e+00 : f32
    %126 = vector.broadcast %cst_56 : f32 to vector<1x128xf32>
    %127 = arith.subf %126, %116 : vector<1x128xf32>
    %128 = arith.mulf %116, %127 : vector<1x128xf32>
    %129 = arith.mulf %120, %120 : vector<1x128xf32>
    %130 = arith.mulf %128, %129 : vector<1x128xf32>
    %131 = arith.subf %125, %130 : vector<1x128xf32>
    %cst_57 = arith.constant 0.000000e+00 : f32
    %132 = vector.broadcast %cst_57 : f32 to vector<1x128xf32>
    %133 = arith.maximumf %131, %132 : vector<1x128xf32>
    %134 = arith.mulf %116, %120 : vector<1x128xf32>
    %135 = vector.broadcast %134 : vector<1x128xf32> to vector<16x128xf32>
    %136 = arith.subf %113, %135 : vector<16x128xf32>
    %137 = vector.broadcast %114 : vector<1x128xf32> to vector<16x128xf32>
    %138 = arith.mulf %137, %136 : vector<16x128xf32>
    %cst_58 = arith.constant 9.99999974E-6 : f32
    %139 = vector.broadcast %cst_58 : f32 to vector<1x128xf32>
    %140 = arith.addf %133, %139 : vector<1x128xf32>
    %141 = math.rsqrt %140 : vector<1x128xf32>
    %142 = vector.broadcast %141 : vector<1x128xf32> to vector<16x128xf32>
    %143 = arith.mulf %138, %142 : vector<16x128xf32>
    %144 = vector.broadcast %115 : vector<1x128xf32> to vector<16x128xf32>
    %145 = arith.addf %143, %144 : vector<16x128xf32>
    %cst_59 = arith.constant 0.000000e+00 : f32
    %146 = vector.broadcast %cst_59 : f32 to vector<16x128xf32>
    %147 = arith.cmpf ogt, %145, %146 : vector<16x128xf32>
    %cst_60 = arith.constant 1.000000e-01 : f32
    %148 = vector.broadcast %cst_60 : f32 to vector<16x128xf32>
    %149 = arith.mulf %148, %145 : vector<16x128xf32>
    %150 = arith.select %147, %145, %149 : vector<16x128xi1>, vector<16x128xf32>
    %cst_61 = arith.constant dense<0.000000e+00> : vector<48x128xf32>
    %151 = tpu.matmul %4, %150, %cst_61 {dimension_numbers = #tpu.dot_dimension_numbers<[1], [0], [0], [1], [0, 0, 1, 1], [], []>} : vector<48x16xf32>, vector<16x128xf32>, vector<48x128xf32> -> vector<48x128xf32>
    %152 = vector.extract_strided_slice %151 {offsets = [0, 0], sizes = [16, 128], strides = [1, 1]} : vector<48x128xf32> to vector<16x128xf32>
    %153 = vector.extract_strided_slice %151 {offsets = [16, 0], sizes = [16, 128], strides = [1, 1]} : vector<48x128xf32> to vector<16x128xf32>
    %154 = vector.extract_strided_slice %151 {offsets = [32, 0], sizes = [16, 128], strides = [1, 1]} : vector<48x128xf32> to vector<16x128xf32>
    %155 = tpu.concatenate %150, %152, %153, %154 in 1 : vector<16x128xf32>, vector<16x128xf32>, vector<16x128xf32>, vector<16x128xf32> -> vector<16x512xf32>
    %c3_62 = arith.constant 3 : index
    %c0_63 = arith.constant 0 : index
    %c0_64 = arith.constant 0 : index
    %156 = vector.load %arg3[%c3_62, %c0_63, %c0_64] : memref<4x512x128xf32, #tpu.memory_space<vmem>>, vector<1x512x128xf32>
    %157 = vector.shape_cast %156 : vector<1x512x128xf32> to vector<512x128xf32>
    %cst_65 = arith.constant dense<0.000000e+00> : vector<16x128xf32>
    %158 = tpu.matmul %155, %157, %cst_65 {dimension_numbers = #tpu.dot_dimension_numbers<[1], [0], [0], [1], [0, 0, 1, 1], [], []>} : vector<16x512xf32>, vector<512x128xf32>, vector<16x128xf32> -> vector<16x128xf32>
    %c12 = arith.constant 12 : index
    %c0_66 = arith.constant 0 : index
    %159 = vector.load %arg4[%c12, %c0_66] : memref<24x128xf32, #tpu.memory_space<vmem>>, vector<1x128xf32>
    %160 = vector.broadcast %159 : vector<1x128xf32> to vector<16x128xf32>
    %161 = arith.addf %158, %160 : vector<16x128xf32>
    %c13 = arith.constant 13 : index
    %c0_67 = arith.constant 0 : index
    %162 = vector.load %arg4[%c13, %c0_67] : memref<24x128xf32, #tpu.memory_space<vmem>>, vector<1x128xf32>
    %c14 = arith.constant 14 : index
    %c0_68 = arith.constant 0 : index
    %163 = vector.load %arg4[%c14, %c0_68] : memref<24x128xf32, #tpu.memory_space<vmem>>, vector<1x128xf32>
    %c15 = arith.constant 15 : index
    %c0_69 = arith.constant 0 : index
    %164 = vector.load %arg4[%c15, %c0_69] : memref<24x128xf32, #tpu.memory_space<vmem>>, vector<1x128xf32>
    %cst_70 = arith.constant dense<0.000000e+00> : vector<128xf32>
    %165 = vector.multi_reduction <add>, %161, %cst_70 [0] : vector<16x128xf32> to vector<128xf32>
    %166 = vector.shape_cast %165 : vector<128xf32> to vector<1x128xf32>
    %cst_71 = arith.constant 6.250000e-02 : f32
    %167 = vector.broadcast %cst_71 : f32 to vector<1x128xf32>
    %168 = arith.mulf %166, %167 : vector<1x128xf32>
    %169 = arith.mulf %161, %161 : vector<16x128xf32>
    %cst_72 = arith.constant dense<0.000000e+00> : vector<128xf32>
    %170 = vector.multi_reduction <add>, %169, %cst_72 [0] : vector<16x128xf32> to vector<128xf32>
    %171 = vector.shape_cast %170 : vector<128xf32> to vector<1x128xf32>
    %cst_73 = arith.constant 6.250000e-02 : f32
    %172 = vector.broadcast %cst_73 : f32 to vector<1x128xf32>
    %173 = arith.mulf %171, %172 : vector<1x128xf32>
    %cst_74 = arith.constant 2.000000e+00 : f32
    %174 = vector.broadcast %cst_74 : f32 to vector<1x128xf32>
    %175 = arith.subf %174, %164 : vector<1x128xf32>
    %176 = arith.mulf %164, %175 : vector<1x128xf32>
    %177 = arith.mulf %168, %168 : vector<1x128xf32>
    %178 = arith.mulf %176, %177 : vector<1x128xf32>
    %179 = arith.subf %173, %178 : vector<1x128xf32>
    %cst_75 = arith.constant 0.000000e+00 : f32
    %180 = vector.broadcast %cst_75 : f32 to vector<1x128xf32>
    %181 = arith.maximumf %179, %180 : vector<1x128xf32>
    %182 = arith.mulf %164, %168 : vector<1x128xf32>
    %183 = vector.broadcast %182 : vector<1x128xf32> to vector<16x128xf32>
    %184 = arith.subf %161, %183 : vector<16x128xf32>
    %185 = vector.broadcast %162 : vector<1x128xf32> to vector<16x128xf32>
    %186 = arith.mulf %185, %184 : vector<16x128xf32>
    %cst_76 = arith.constant 9.99999974E-6 : f32
    %187 = vector.broadcast %cst_76 : f32 to vector<1x128xf32>
    %188 = arith.addf %181, %187 : vector<1x128xf32>
    %189 = math.rsqrt %188 : vector<1x128xf32>
    %190 = vector.broadcast %189 : vector<1x128xf32> to vector<16x128xf32>
    %191 = arith.mulf %186, %190 : vector<16x128xf32>
    %192 = vector.broadcast %163 : vector<1x128xf32> to vector<16x128xf32>
    %193 = arith.addf %191, %192 : vector<16x128xf32>
    %194 = arith.addf %6, %193 : vector<16x128xf32>
    %cst_77 = arith.constant 0.000000e+00 : f32
    %195 = vector.broadcast %cst_77 : f32 to vector<16x128xf32>
    %196 = arith.maximumf %194, %195 : vector<16x128xf32>
    %cst_78 = arith.constant dense<0.000000e+00> : vector<128xf32>
    %197 = vector.multi_reduction <add>, %196, %cst_78 [0] : vector<16x128xf32> to vector<128xf32>
    %198 = vector.shape_cast %197 : vector<128xf32> to vector<1x128xf32>
    %cst_79 = arith.constant 6.250000e-02 : f32
    %199 = vector.broadcast %cst_79 : f32 to vector<1x128xf32>
    %200 = arith.mulf %198, %199 : vector<1x128xf32>
    %cst_80 = arith.constant 0.000000e+00 : f32
    %201 = vector.broadcast %cst_80 : f32 to vector<1x128xf32>
    %202 = arith.maximumf %200, %201 : vector<1x128xf32>
    %c0_81 = arith.constant 0 : index
    %c0_82 = arith.constant 0 : index
    %203 = vector.load %arg5[%c0_81, %c0_82] : memref<128x128xf32, #tpu.memory_space<vmem>>, vector<128x128xf32>
    %cst_83 = arith.constant dense<0.000000e+00> : vector<1x128xf32>
    %204 = tpu.matmul %202, %203, %cst_83 {dimension_numbers = #tpu.dot_dimension_numbers<[1], [0], [0], [1], [0, 0, 1, 1], [], []>} : vector<1x128xf32>, vector<128x128xf32>, vector<1x128xf32> -> vector<1x128xf32>
    %c16 = arith.constant 16 : index
    %c0_84 = arith.constant 0 : index
    %205 = vector.load %arg4[%c16, %c0_84] : memref<24x128xf32, #tpu.memory_space<vmem>>, vector<1x128xf32>
    %206 = arith.addf %204, %205 : vector<1x128xf32>
    %207 = tpu.iota {dimensions = array<i32: 1>} : vector<1x128xi32>
    %cst_85 = arith.constant 0.000000e+00 : f32
    %208 = vector.broadcast %cst_85 : f32 to vector<1x128xf32>
    %c0_i32 = arith.constant 0 : i32
    %209 = vector.broadcast %c0_i32 : i32 to vector<1x128xi32>
    %210 = arith.cmpi sge, %207, %209 : vector<1x128xi32>
    %c4_i32 = arith.constant 4 : i32
    %211 = vector.broadcast %c4_i32 : i32 to vector<1x128xi32>
    %212 = arith.cmpi slt, %207, %211 : vector<1x128xi32>
    %213 = arith.andi %210, %212 : vector<1x128xi1>
    %cst_86 = arith.constant 0xFF800000 : f32
    %214 = vector.broadcast %cst_86 : f32 to vector<1x128xf32>
    %215 = arith.select %213, %206, %214 : vector<1x128xi1>, vector<1x128xf32>
    %cst_87 = arith.constant dense<0xFF800000> : vector<1xf32>
    %216 = vector.multi_reduction <maximumf>, %215, %cst_87 [1] : vector<1x128xf32> to vector<1xf32>
    %217 = vector.shape_cast %216 : vector<1xf32> to vector<1x1xf32>
    %218 = vector.broadcast %217 : vector<1x1xf32> to vector<1x128xf32>
    %219 = arith.subf %206, %218 : vector<1x128xf32>
    %220 = math.exp %219 : vector<1x128xf32>
    %cst_88 = arith.constant 0.000000e+00 : f32
    %221 = vector.broadcast %cst_88 : f32 to vector<1x128xf32>
    %222 = arith.select %213, %220, %221 : vector<1x128xi1>, vector<1x128xf32>
    %cst_89 = arith.constant dense<0.000000e+00> : vector<1xf32>
    %223 = vector.multi_reduction <add>, %222, %cst_89 [1] : vector<1x128xf32> to vector<1xf32>
    %224 = vector.shape_cast %223 : vector<1xf32> to vector<1x1xf32>
    %225 = vector.broadcast %224 : vector<1x1xf32> to vector<1x128xf32>
    %226 = arith.divf %222, %225 : vector<1x128xf32>
    %227 = arith.addf %208, %226 : vector<1x128xf32>
    %c4_i32_90 = arith.constant 4 : i32
    %228 = vector.broadcast %c4_i32_90 : i32 to vector<1x128xi32>
    %229 = arith.cmpi sge, %207, %228 : vector<1x128xi32>
    %c8_i32 = arith.constant 8 : i32
    %230 = vector.broadcast %c8_i32 : i32 to vector<1x128xi32>
    %231 = arith.cmpi slt, %207, %230 : vector<1x128xi32>
    %232 = arith.andi %229, %231 : vector<1x128xi1>
    %cst_91 = arith.constant 0xFF800000 : f32
    %233 = vector.broadcast %cst_91 : f32 to vector<1x128xf32>
    %234 = arith.select %232, %206, %233 : vector<1x128xi1>, vector<1x128xf32>
    %cst_92 = arith.constant dense<0xFF800000> : vector<1xf32>
    %235 = vector.multi_reduction <maximumf>, %234, %cst_92 [1] : vector<1x128xf32> to vector<1xf32>
    %236 = vector.shape_cast %235 : vector<1xf32> to vector<1x1xf32>
    %237 = vector.broadcast %236 : vector<1x1xf32> to vector<1x128xf32>
    %238 = arith.subf %206, %237 : vector<1x128xf32>
    %239 = math.exp %238 : vector<1x128xf32>
    %cst_93 = arith.constant 0.000000e+00 : f32
    %240 = vector.broadcast %cst_93 : f32 to vector<1x128xf32>
    %241 = arith.select %232, %239, %240 : vector<1x128xi1>, vector<1x128xf32>
    %cst_94 = arith.constant dense<0.000000e+00> : vector<1xf32>
    %242 = vector.multi_reduction <add>, %241, %cst_94 [1] : vector<1x128xf32> to vector<1xf32>
    %243 = vector.shape_cast %242 : vector<1xf32> to vector<1x1xf32>
    %244 = vector.broadcast %243 : vector<1x1xf32> to vector<1x128xf32>
    %245 = arith.divf %241, %244 : vector<1x128xf32>
    %246 = arith.addf %227, %245 : vector<1x128xf32>
    %c8_i32_95 = arith.constant 8 : i32
    %247 = vector.broadcast %c8_i32_95 : i32 to vector<1x128xi32>
    %248 = arith.cmpi sge, %207, %247 : vector<1x128xi32>
    %c12_i32 = arith.constant 12 : i32
    %249 = vector.broadcast %c12_i32 : i32 to vector<1x128xi32>
    %250 = arith.cmpi slt, %207, %249 : vector<1x128xi32>
    %251 = arith.andi %248, %250 : vector<1x128xi1>
    %cst_96 = arith.constant 0xFF800000 : f32
    %252 = vector.broadcast %cst_96 : f32 to vector<1x128xf32>
    %253 = arith.select %251, %206, %252 : vector<1x128xi1>, vector<1x128xf32>
    %cst_97 = arith.constant dense<0xFF800000> : vector<1xf32>
    %254 = vector.multi_reduction <maximumf>, %253, %cst_97 [1] : vector<1x128xf32> to vector<1xf32>
    %255 = vector.shape_cast %254 : vector<1xf32> to vector<1x1xf32>
    %256 = vector.broadcast %255 : vector<1x1xf32> to vector<1x128xf32>
    %257 = arith.subf %206, %256 : vector<1x128xf32>
    %258 = math.exp %257 : vector<1x128xf32>
    %cst_98 = arith.constant 0.000000e+00 : f32
    %259 = vector.broadcast %cst_98 : f32 to vector<1x128xf32>
    %260 = arith.select %251, %258, %259 : vector<1x128xi1>, vector<1x128xf32>
    %cst_99 = arith.constant dense<0.000000e+00> : vector<1xf32>
    %261 = vector.multi_reduction <add>, %260, %cst_99 [1] : vector<1x128xf32> to vector<1xf32>
    %262 = vector.shape_cast %261 : vector<1xf32> to vector<1x1xf32>
    %263 = vector.broadcast %262 : vector<1x1xf32> to vector<1x128xf32>
    %264 = arith.divf %260, %263 : vector<1x128xf32>
    %265 = arith.addf %246, %264 : vector<1x128xf32>
    %266 = vector.extract_strided_slice %265 {offsets = [0, 0], sizes = [1, 12], strides = [1, 1]} : vector<1x128xf32> to vector<1x12xf32>
    %267 = vector.shape_cast %266 : vector<1x12xf32> to vector<1x1x12xf32>
    %c0_100 = arith.constant 0 : index
    %c0_101 = arith.constant 0 : index
    %c0_102 = arith.constant 0 : index
    %268 = vector.load %arg6[%c0_100, %c0_101, %c0_102] : memref<1x1x12xf32, #tpu.memory_space<vmem>>, vector<1x1x12xf32>
    tpu.vector_store %arg6[%c0_100, %c0_101, %c0_102], %267 {strides = array<i32>} : memref<1x1x12xf32, #tpu.memory_space<vmem>>, vector<1x1x12xf32>,
    return
  }
  func.func @transform_0(%arg0: i32) -> (i32, i32, i32) {
    %c0_i32 = arith.constant 0 : i32
    %c0_i32_0 = arith.constant 0 : i32
    %c0_i32_1 = arith.constant 0 : i32
    return %arg0, %c0_i32, %c0_i32_0 : i32, i32, i32
  }
  func.func @transform_1(%arg0: i32) -> (i32, i32, i32) {
    %c0_i32 = arith.constant 0 : i32
    %c0_i32_0 = arith.constant 0 : i32
    %c0_i32_1 = arith.constant 0 : i32
    return %arg0, %c0_i32, %c0_i32_0 : i32, i32, i32
  }
  func.func @transform_2(%arg0: i32) -> (i32, i32, i32) {
    %c0_i32 = arith.constant 0 : i32
    %c0_i32_0 = arith.constant 0 : i32
    %c0_i32_1 = arith.constant 0 : i32
    %c0_i32_2 = arith.constant 0 : i32
    return %c0_i32, %c0_i32_0, %c0_i32_1 : i32, i32, i32
  }
  func.func @transform_3(%arg0: i32) -> (i32, i32) {
    %c0_i32 = arith.constant 0 : i32
    %c0_i32_0 = arith.constant 0 : i32
    %c0_i32_1 = arith.constant 0 : i32
    return %c0_i32, %c0_i32_0 : i32, i32
  }
  func.func @transform_4(%arg0: i32) -> (i32, i32) {
    %c0_i32 = arith.constant 0 : i32
    %c0_i32_0 = arith.constant 0 : i32
    %c0_i32_1 = arith.constant 0 : i32
    return %c0_i32, %c0_i32_0 : i32, i32
  }
  func.func @transform_5(%arg0: i32) -> (i32, i32, i32) {
    %c0_i32 = arith.constant 0 : i32
    %c0_i32_0 = arith.constant 0 : i32
    %c0_i32_1 = arith.constant 0 : i32
    return %arg0, %c0_i32, %c0_i32_0 : i32, i32, i32
  }
}

</mosaic_0001>

<bundles_post_ra>
// kernel: cheb_gcn3_multi_softmax.1
= control target key start
LH: loop header
LB: loop body
LE: loop exit
PB: predicated region body
PF: predicated region fallthrough
CT: control target
= control target key end

     0   :  { %10 = vsyncpa [#allocation3], 0  ;;  %s1539_s21 = smov [#allocation2]   ;;  %s1540_s23 = smov 128   ;;  %s2558_s0 = inlined_call_operand.vmem [shape: f32[1,16,16], index: 0, kind: input, shape index: {}]   ;;  %s2559_s1 = inlined_call_operand.vmem [shape: f32[1,16,128], index: 1, kind: input, shape index: {}]   ;;  %s2560_s2 = inlined_call_operand.vmem [shape: f32[4,512,128], index: 2, kind: input, shape index: {}]   ;;  %s2561_s3 = inlined_call_operand.vmem [shape: f32[24,128], index: 3, kind: input, shape index: {}]   ;;  %s2562_s4 = inlined_call_operand.hbm [shape: f32[128,128], index: 4, kind: input, shape index: {}]   ;;  %s2563_s5 = inlined_call_operand.vmem [shape: f32[1,1,12], index: 5, kind: output, shape index: {}]  }
   0x1   :  { %s23_s20 = sshll.u32 %s2562_s4, 4  ;;  %s25_s22 = sshll.u32 %s1539_s21, 4  ;;  %s24_s20 = int_to_ptr.hbm [resolvable:$true] %s23_s20  ;;  %s26_s22 = int_to_ptr.vmem [resolvable:$true] %s25_s22 }
   0x2   :  { %s1541_s24 = smov 8  }
   0x3   :  { %31 = dma.hbm_to_vmem [thread:$0]  %s24_s20, 2048, %s26_s22, [#allocation3], %s1540_s23, %s1540_s23, %s1541_s24  }
   0x4   :  { %1537 = dma.done.wait [#allocation3], 2048  }
   0x5   :  { %1538 = vsyncadd [#allocation3], 4294965248  ;;  %v1578_v0 = vld [vmem:[%s2558_s0 + $0x8] sm:$0xff]  ;;  %v1583_v1 = vld [vmem:[%s2558_s0] sm:$0xff]  ;;  %vm38_vm0 = vcmask 130048  }
   0x6   :  { %v1588_v2 = vld [vmem:[%s2559_s1 + $0x8] sm:$0xff]  ;;  %59 = vmatpush.msra.mxu0 %v1578_v0  ;;  %v1595_v3 = vld [vmem:[%s2559_s1] sm:$0xff]  ;;  %v155_v5 = vld [vmem:[%s2560_s2 + $0x78] sm:$0xff] }
   0x7   :  { %119 = vmatpush.msra.mxu2 %v1588_v2  ;;  %1472 = vmatpush.msra.mxu3 %v1588_v2  ;;  %v154_v6 = vld [vmem:[%s2560_s2 + $0x70] sm:$0xff]  ;;  %v153_v7 = vld [vmem:[%s2560_s2 + $0x68] sm:$0xff]  ;;  %v152_v8 = vld [vmem:[%s2560_s2 + $0x60] sm:$0xff] }
   0x8   :  { %60 = vmatpush.msra.mxu0 %v1583_v1  ;;  %v151_v10 = vld [vmem:[%s2560_s2 + $0x58] sm:$0xff]  ;;  %v186_v13 = vld [vmem:[%s2560_s2 + $0x170] sm:$0xff]  ;;  %v185_v14 = vld [vmem:[%s2560_s2 + $0x168] sm:$0xff] }
   0x9   :  { %120 = vmatpush.msra.mxu2 %v1595_v3  ;;  %1252 = vmatmul.msk.f32.vlgmr.msra.gmra.mxu0 %vm38_vm0, %v1583_v1  ;;  %v171_v11 = vld [vmem:[%s2560_s2 + $0xf8] sm:$0xff]  ;;  %v184_v15 = vld [vmem:[%s2560_s2 + $0x160] sm:$0xff]  ;;  %v182_v17 = vld [vmem:[%s2560_s2 + $0x150] sm:$0xff] }
   0xa   :  { %1256 = vmatmul.msk.f32.vlgmr.msra.gmra.mxu2 %vm38_vm0, %v1583_v1  ;;  %1473 = vmatpush.msra.mxu3 %v1595_v3  ;;  %v187_v12 = vld [vmem:[%s2560_s2 + $0x178] sm:$0xff]  ;;  %v181_v18 = vld [vmem:[%s2560_s2 + $0x148] sm:$0xff]  ;;  %v180_v19 = vld [vmem:[%s2560_s2 + $0x140] sm:$0xff] }
   0xb   :  { %229 = vmatpush.msrb.mxu0 %v171_v11  ;;  %v183_v16 = vld [vmem:[%s2560_s2 + $0x158] sm:$0xff]  ;;  %v178_v21 = vld [vmem:[%s2560_s2 + $0x130] sm:$0xff]  ;;  %v177_v22 = vld [vmem:[%s2560_s2 + $0x128] sm:$0xff] }
   0xc   :  { %206 = vmatpush.msrb.mxu3 %v155_v5  ;;  %v179_v20 = vld [vmem:[%s2560_s2 + $0x138] sm:$0xff]  ;;  %v176_v23 = vld [vmem:[%s2560_s2 + $0x120] sm:$0xff]  ;;  %v174_v25 = vld [vmem:[%s2560_s2 + $0x110] sm:$0xff] }
   0xd   :  { %v175_v24 = vld [vmem:[%s2560_s2 + $0x118] sm:$0xff]  ;;  %v173_v26 = vld [vmem:[%s2560_s2 + $0x108] sm:$0xff]  ;;  %v172_v27 = vld [vmem:[%s2560_s2 + $0x100] sm:$0xff] }
   0xe   :  { %207 = vmatpush.msrb.mxu3 %v154_v6  ;;  %v150_v28 = vld [vmem:[%s2560_s2 + $0x50] sm:$0xff]  ;;  %v149_v30 = vld [vmem:[%s2560_s2 + $0x48] sm:$0xff]  ;;  %v148_v32 = vld [vmem:[%s2560_s2 + $0x40] sm:$0xff] }
   0xf   :  { %v170_v29 = vld [vmem:[%s2560_s2 + $0xf0] sm:$0xff]  ;;  %v169_v31 = vld [vmem:[%s2560_s2 + $0xe8] sm:$0xff]  ;;  %v168_v33 = vld [vmem:[%s2560_s2 + $0xe0] sm:$0xff] }
  0x10   :  { %208 = vmatpush.msrb.mxu3 %v153_v7  ;;  %230 = vmatpush.msrb.mxu0 %v170_v29  ;;  %v147_v34 = vld [vmem:[%s2560_s2 + $0x38] sm:$0xff]  ;;  %v146_v36 = vld [vmem:[%s2560_s2 + $0x30] sm:$0xff]  ;;  %v145_v38 = vld [vmem:[%s2560_s2 + $0x28] sm:$0xff] }
  0x11   :  { %1253 = vmatmul.msk.f32.gmra.mxu0 %vm38_vm0, %v1578_v0  ;;  %v167_v35 = vld [vmem:[%s2560_s2 + $0xd8] sm:$0xff]  ;;  %v166_v37 = vld [vmem:[%s2560_s2 + $0xd0] sm:$0xff]  ;;  %v165_v39 = vld [vmem:[%s2560_s2 + $0xc8] sm:$0xff] }
  0x12   :  { %1257 = vmatmul.msk.f32.gmra.mxu2 %vm38_vm0, %v1578_v0  ;;  %209 = vmatpush.msrb.mxu3 %v152_v8  ;;  %v144_v41 = vld [vmem:[%s2560_s2 + $0x20] sm:$0xff]  ;;  %v143_v43 = vld [vmem:[%s2560_s2 + $0x18] sm:$0xff]  ;;  %v142_v45 = vld [vmem:[%s2560_s2 + $0x10] sm:$0xff] }
  0x13   :  { %231 = vmatpush.msrb.mxu0 %v169_v31  ;;  %v164_v42 = vld [vmem:[%s2560_s2 + $0xc0] sm:$0xff]  ;;  %v163_v44 = vld [vmem:[%s2560_s2 + $0xb8] sm:$0xff]  ;;  %v162_v46 = vld [vmem:[%s2560_s2 + $0xb0] sm:$0xff] }
  0x14   :  { %210 = vmatpush.msrb.mxu3 %v151_v10  ;;  %v141_v47 = vld [vmem:[%s2560_s2 + $0x8] sm:$0xff]  ;;  %v140_v49 = vld [vmem:[%s2560_s2] sm:$0xff]  ;;  %v159_v52 = vld [vmem:[%s2560_s2 + $0x98] sm:$0xff] }
  0x15   :  { %232 = vmatpush.msrb.mxu0 %v168_v33  ;;  %v161_v48 = vld [vmem:[%s2560_s2 + $0xa8] sm:$0xff]  ;;  %v160_v50 = vld [vmem:[%s2560_s2 + $0xa0] sm:$0xff]  ;;  %v158_v53 = vld [vmem:[%s2560_s2 + $0x90] sm:$0xff] }
  0x16   :  { %211 = vmatpush.msrb.mxu3 %v150_v28  ;;  %v157_v54 = vld [vmem:[%s2560_s2 + $0x88] sm:$0xff]  ;;  %v156_v55 = vld [vmem:[%s2560_s2 + $0x80] sm:$0xff]  ;;  %v203_v56 = vld [vmem:[%s2560_s2 + $0x1f8] sm:$0xff] }
  0x17   :  { %233 = vmatpush.msrb.mxu0 %v167_v35  ;;  %v202_v57 = vld [vmem:[%s2560_s2 + $0x1f0] sm:$0xff]  ;;  %275 = vmatpush.msrb.mxu2 %v203_v56  ;;  %v201_v59 = vld [vmem:[%s2560_s2 + $0x1e8] sm:$0xff]  ;;  %v200_v60 = vld [vmem:[%s2560_s2 + $0x1e0] sm:$0xff] }
  0x18   :  { %212 = vmatpush.msrb.mxu3 %v149_v30  ;;  %v199_v61 = vld [vmem:[%s2560_s2 + $0x1d8] sm:$0xff]  ;;  %v198_v63 = vld [vmem:[%s2560_s2 + $0x1d0] sm:$0xff]  ;;  %v197_v6 = vld [vmem:[%s2560_s2 + $0x1c8] sm:$0xff] }
  0x19   :  { %234 = vmatpush.msrb.mxu0 %v166_v37  ;;  %276 = vmatpush.msrb.mxu2 %v202_v57  ;;  %v196_v7 = vld [vmem:[%s2560_s2 + $0x1c0] sm:$0xff]  ;;  %v195_v8 = vld [vmem:[%s2560_s2 + $0x1b8] sm:$0xff]  ;;  %v194_v11 = vld [vmem:[%s2560_s2 + $0x1b0] sm:$0xff] }
  0x1a   :  { %213 = vmatpush.msrb.mxu3 %v148_v32  ;;  %v1282_v29 = vld [vmem:[%s2560_s2 + $0x270] sm:$0xff]  ;;  %v1281_v31 = vld [vmem:[%s2560_s2 + $0x268] sm:$0xff] }
  0x1b   :  { %235 = vmatpush.msrb.mxu0 %v165_v39  ;;  %277 = vmatpush.msrb.mxu2 %v201_v59  ;;  %v1273_v57 = vld [vmem:[%s2560_s2 + $0x228] sm:$0xff] }
  0x1c   :  { %214 = vmatpush.msrb.mxu3 %v147_v34  ;;  %v1280_v34 = vld [vmem:[%s2560_s2 + $0x260] sm:$0xff] }
  0x1d   :  { %236 = vmatpush.msrb.mxu0 %v164_v42  ;;  %278 = vmatpush.msrb.mxu2 %v200_v60 }
  0x1e   :  { %215 = vmatpush.msrb.mxu3 %v146_v36 }
  0x1f   :  { %237 = vmatpush.msrb.mxu0 %v163_v44  ;;  %279 = vmatpush.msrb.mxu2 %v199_v61  ;;  %v1277_v44 = vld [vmem:[%s2560_s2 + $0x248] sm:$0xff]  ;;  %v1272_v61 = vld [vmem:[%s2560_s2 + $0x220] sm:$0xff] }
  0x20   :  { %216 = vmatpush.msrb.mxu3 %v145_v38  ;;  %v1279_v38 = vld [vmem:[%s2560_s2 + $0x258] sm:$0xff] }
  0x21   :  { %238 = vmatpush.msrb.mxu0 %v162_v46  ;;  %280 = vmatpush.msrb.mxu2 %v198_v63 }
  0x22   :  { %217 = vmatpush.msrb.mxu3 %v144_v41 }
  0x23   :  { %239 = vmatpush.msrb.mxu0 %v161_v48  ;;  %281 = vmatpush.msrb.mxu2 %v197_v6  ;;  %v1271_v6 = vld [vmem:[%s2560_s2 + $0x218] sm:$0xff] }
  0x24   :  { %218 = vmatpush.msrb.mxu3 %v143_v43 }
  0x25   :  { %240 = vmatpush.msrb.mxu0 %v160_v50  ;;  %282 = vmatpush.msrb.mxu2 %v196_v7  ;;  %v1275_v50 = vld [vmem:[%s2560_s2 + $0x238] sm:$0xff] }
  0x26   :  { %219 = vmatpush.msrb.mxu3 %v142_v45 }
  0x27   :  { %241 = vmatpush.msrb.mxu0 %v159_v52  ;;  %283 = vmatpush.msrb.mxu2 %v195_v8 }
  0x28   :  { %220 = vmatpush.msrb.mxu3 %v141_v47  ;;  %v1276_v47 = vld [vmem:[%s2560_s2 + $0x240] sm:$0xff] }
  0x29   :  { %242 = vmatpush.msrb.mxu0 %v158_v53  ;;  %284 = vmatpush.msrb.mxu2 %v194_v11  ;;  %v300_v53 = vld [vmem:[%s2561_s3 + $0x3] sm:$0x1] }
  0x2a   :  { %221 = vmatpush.msrb.mxu3 %v140_v49  ;;  %v319_v60 = vsub.f32 2.0, %v300_v53 }
  0x2b   :  { %243 = vmatpush.msrb.mxu0 %v157_v54  ;;  %v1274_v54 = vld [vmem:[%s2560_s2 + $0x230] sm:$0xff] }
  0x2c   :  { %v320_v11 = vmul.f32 %v319_v60, %v300_v53  ;;  %v1286_v60 = vld [vmem:[%s2560_s2 + $0x290] sm:$0xff] }
  0x2d   :  { %244 = vmatpush.msrb.mxu0 %v156_v55 }
  0x86   :  { %v1609_v4 = vpop.f32.mrf.mxu0 }
  0x87   :  { %1258 = vmatmul.msk.f32.gmra.mxu2 %vm38_vm0, %v1609_v4 }
  0x8d   :  { %v122_v40 = vpop.f32.mrf.mxu2 }
  0x8e   :  { %v1625_v9 = vpop.f32.mrf.mxu0  ;;  %245 = vmatmul.f32.vlgmr.msrb.gmra.mxu0 %v122_v40  ;;  %v1278_v40 = vld [vmem:[%s2560_s2 + $0x250] sm:$0xff] }
  0x8f   :  { %82 = vmatpush.msra.mxu1 %v1625_v9  ;;  %1259 = vmatmul.msk.f32.gmra.mxu2 %vm38_vm0, %v1625_v9 }
  0x91   :  { %83 = vmatpush.msra.mxu1 %v1609_v4 }
  0x92   :  { %1254 = vmatmul.msk.f32.vlgmr.msra.gmra.mxu1 %vm38_vm0, %v1583_v1 }
  0x93   :  { %252 = vmatpush.msrb.mxu1 %v187_v12  ;;  %v193_v12 = vld [vmem:[%s2560_s2 + $0x1a8] sm:$0xff] }
  0x94   :  { %285 = vmatpush.msrb.mxu2 %v193_v12  ;;  %v1270_v12 = vld [vmem:[%s2560_s2 + $0x210] sm:$0xff] }
  0x95   :  { %253 = vmatpush.msrb.mxu1 %v186_v13  ;;  %v125_v51 = vpop.f32.mrf.mxu2  ;;  %v192_v13 = vld [vmem:[%s2560_s2 + $0x1a0] sm:$0xff] }
  0x96   :  { %248 = vmatmul.f32.gmra.mxu0 %v125_v51  ;;  %286 = vmatpush.msrb.mxu2 %v192_v13  ;;  %v1269_v13 = vld [vmem:[%s2560_s2 + $0x208] sm:$0xff] }
  0x97   :  { %254 = vmatpush.msrb.mxu1 %v185_v14  ;;  %v191_v14 = vld [vmem:[%s2560_s2 + $0x198] sm:$0xff] }
  0x98   :  { %287 = vmatpush.msrb.mxu2 %v191_v14 }
  0x99   :  { %255 = vmatpush.msrb.mxu1 %v184_v15  ;;  %v188_v15 = vld [vmem:[%s2560_s2 + $0x180] sm:$0xff] }
  0x9a   :  { %1255 = vmatmul.msk.f32.gmra.mxu1 %vm38_vm0, %v1578_v0 }
  0x9b   :  { %256 = vmatpush.msrb.mxu1 %v183_v16 }
  0x9d   :  { %257 = vmatpush.msrb.mxu1 %v182_v17 }
  0x9f   :  { %258 = vmatpush.msrb.mxu1 %v181_v18 }
  0xa1   :  { %259 = vmatpush.msrb.mxu1 %v180_v19 }
  0xa3   :  { %260 = vmatpush.msrb.mxu1 %v179_v20  ;;  %v1477_v20 = vld [vmem:[%s2561_s3] ss:$0 sm:$0xff] }
  0xa5   :  { %261 = vmatpush.msrb.mxu1 %v178_v21 }
  0xa7   :  { %262 = vmatpush.msrb.mxu1 %v177_v22 }
  0xa9   :  { %263 = vmatpush.msrb.mxu1 %v176_v23 }
  0xab   :  { %264 = vmatpush.msrb.mxu1 %v175_v24 }
  0xad   :  { %265 = vmatpush.msrb.mxu1 %v174_v25 }
  0xaf   :  { %266 = vmatpush.msrb.mxu1 %v173_v26 }
  0xb1   :  { %267 = vmatpush.msrb.mxu1 %v172_v27  ;;  %v1283_v27 = vld [vmem:[%s2560_s2 + $0x278] sm:$0xff] }
  0xb2   :  { %457 = vmatpush.msra.mxu0 %v1283_v27 }
  0xb4   :  { %458 = vmatpush.msra.mxu0 %v1282_v29 }
  0xb6   :  { %459 = vmatpush.msra.mxu0 %v1281_v31 }
  0xb8   :  { %460 = vmatpush.msra.mxu0 %v1280_v34  ;;  %v1479_v34 = vld [vmem:[%s2561_s3 + $0x2] ss:$0 sm:$0xff] }
  0xba   :  { %461 = vmatpush.msra.mxu0 %v1279_v38 }
  0xbc   :  { %462 = vmatpush.msra.mxu0 %v1278_v40 }
  0xbe   :  { %463 = vmatpush.msra.mxu0 %v1277_v44  ;;  %v1298_v44 = vld [vmem:[%s2560_s2 + $0x2f0] sm:$0xff] }
  0xc0   :  { %464 = vmatpush.msra.mxu0 %v1276_v47  ;;  %v1296_v47 = vld [vmem:[%s2560_s2 + $0x2e0] sm:$0xff] }
  0xc2   :  { %465 = vmatpush.msra.mxu0 %v1275_v50  ;;  %v1294_v50 = vld [vmem:[%s2560_s2 + $0x2d0] sm:$0xff] }
  0xc4   :  { %466 = vmatpush.msra.mxu0 %v1274_v54  ;;  %v1290_v54 = vld [vmem:[%s2560_s2 + $0x2b0] sm:$0xff] }
  0xc6   :  { %467 = vmatpush.msra.mxu0 %v1273_v57  ;;  %v1312_v57 = vld [vmem:[%s2560_s2 + $0x360] sm:$0xff] }
  0xc8   :  { %468 = vmatpush.msra.mxu0 %v1272_v61  ;;  %v1310_v61 = vld [vmem:[%s2560_s2 + $0x350] sm:$0xff] }
  0xca   :  { %469 = vmatpush.msra.mxu0 %v1271_v6  ;;  %v1309_v6 = vld [vmem:[%s2560_s2 + $0x348] sm:$0xff] }
  0xcc   :  { %470 = vmatpush.msra.mxu0 %v1270_v12  ;;  %v1307_v12 = vld [vmem:[%s2560_s2 + $0x338] sm:$0xff] }
  0xce   :  { %471 = vmatpush.msra.mxu0 %v1269_v13  ;;  %v1306_v13 = vld [vmem:[%s2560_s2 + $0x330] sm:$0xff] }
 0x10a   :  { %v128_v58 = vpop.f32.mrf.mxu2 }
 0x10b   :  { %268 = vmatmul.f32.vlgmr.msrb.gmra.mxu1 %v128_v58  ;;  %v246_v19 = vpop.f32.mrf.mxu0 }
 0x10f   :  { %v1782_v62 = vpop.f32.mrf.mxu1 }
 0x110   :  { %1260 = vmatmul.msk.f32.vlgmr.msra.gmra.mxu3 %vm38_vm0, %v1782_v62 }
 0x112   :  { %v131_v5 = vpop.f32.mrf.mxu2 }
 0x113   :  { %271 = vmatmul.f32.gmra.mxu1 %v131_v5  ;;  %v249_v25 = vpop.f32.mrf.mxu0 }
 0x117   :  { %v1798_v10 = vpop.f32.mrf.mxu1 }
 0x118   :  { %1261 = vmatmul.msk.f32.gmra.mxu3 %vm38_vm0, %v1798_v10 }
 0x120   :  { %222 = vmatmul.f32.vlgmr.msrb.gmra.mxu3 %v1595_v3  ;;  %v190_v3 = vld [vmem:[%s2560_s2 + $0x190] sm:$0xff] }
 0x121   :  { %288 = vmatpush.msrb.mxu2 %v190_v3  ;;  %v1268_v3 = vld [vmem:[%s2560_s2 + $0x200] sm:$0xff] }
 0x122   :  { %472 = vmatpush.msra.mxu0 %v1268_v3  ;;  %v1305_v3 = vld [vmem:[%s2560_s2 + $0x328] sm:$0xff] }
 0x128   :  { %225 = vmatmul.f32.gmra.mxu3 %v1588_v2  ;;  %v189_v2 = vld [vmem:[%s2560_s2 + $0x188] sm:$0xff] }
 0x129   :  { %289 = vmatpush.msrb.mxu2 %v189_v2 }
 0x12b   :  { %290 = vmatpush.msrb.mxu2 %v188_v15 }
 0x188   :  { %v269_v21 = vpop.f32.mrf.mxu1 }
 0x190   :  { %v272_v33 = vpop.f32.mrf.mxu1 }
 0x193   :  { %v134_v16 = vpop.f32.mrf.mxu3 }
 0x194   :  { %291 = vmatmul.f32.vlgmr.msrb.gmra.mxu2 %v134_v16 }
 0x19b   :  { %v137_v17 = vpop.f32.mrf.mxu3 }
 0x19c   :  { %294 = vmatmul.f32.gmra.mxu2 %v137_v17 }
 0x1a3   :  { %v223_v18 = vpop.f32.mrf.mxu3 }
 0x1a4   :  { %v224_v23 = vadd.f32 %v1477_v20, %v223_v18 }
 0x1a6   :  { %v247_v28 = vadd.f32 %v246_v19, %v224_v23 }
 0x1a8   :  { %v270_v32 = vadd.f32 %v269_v21, %v247_v28  ;;  %v1478_v28 = vld [vmem:[%s2561_s3 + $0x1] ss:$0 sm:$0xff] }
 0x1ab   :  { %v226_v22 = vpop.f32.mrf.mxu3 }
 0x1ac   :  { %v227_v24 = vadd.f32 %v1477_v20, %v226_v22 }
 0x1ae   :  { %v250_v30 = vadd.f32 %v249_v25, %v227_v24 }
 0x1b0   :  { %v273_v36 = vadd.f32 %v272_v33, %v250_v30 }
 0x217   :  { %v292_v26 = vpop.f32.mrf.mxu2 }
 0x218   :  { %v1840_v35 = vadd.f32 %v292_v26, %v270_v32 }
 0x21a   :  { %v309_v41 = vmul.f32 %v1840_v35, %v1840_v35 }
 0x21f   :  { %v295_v37 = vpop.f32.mrf.mxu2 }
 0x220   :  { %v296_v39 = vadd.f32 %v295_v37, %v273_v36 }
 0x222   :  { %v301_v42 = vadd.f32 %v296_v39, %v1840_v35  ;;  %v310_v43 = vmul.f32 %v296_v39, %v296_v39 }
 0x224   :  { %v302_v45 = vrot.slane %v301_v42, 4  ;;  %v311_v46 = vadd.f32 %v310_v43, %v309_v41  ;;  %v1299_v43 = vld [vmem:[%s2560_s2 + $0x2f8] sm:$0xff] }
 0x225   :  { %480 = vmatpush.msra.mxu1 %v1299_v43 }
 0x226   :  { %v303_v48 = vadd.f32 %v302_v45, %v301_v42  ;;  %v312_v49 = vrot.slane %v311_v46, 4  ;;  %v1297_v45 = vld [vmem:[%s2560_s2 + $0x2e8] sm:$0xff] }
 0x227   :  { %481 = vmatpush.msra.mxu1 %v1298_v44  ;;  %v1353_v44 = vld [vmem:[%s2560_s2 + $0x478] sm:$0xff] }
 0x228   :  { %v304_v51 = vrot.slane %v303_v48, 2  ;;  %v313_v52 = vadd.f32 %v312_v49, %v311_v46  ;;  %v1315_v46 = vld [vmem:[%s2560_s2 + $0x378] sm:$0xff] }
 0x229   :  { %503 = vmatpush.msra.mxu2 %v1315_v46  ;;  %482 = vmatpush.msra.mxu1 %v1297_v45  ;;  %v1295_v49 = vld [vmem:[%s2560_s2 + $0x2d8] sm:$0xff] }
 0x22a   :  { %v305_v55 = vadd.f32 %v304_v51, %v303_v48  ;;  %v314_v56 = vrot.slane %v313_v52, 2  ;;  %v1313_v48 = vld [vmem:[%s2560_s2 + $0x368] sm:$0xff] }
 0x22b   :  { %483 = vmatpush.msra.mxu1 %v1296_v47  ;;  %v1293_v51 = vld [vmem:[%s2560_s2 + $0x2c8] sm:$0xff] }
 0x22c   :  { %v306_v58 = vrot.slane %v305_v55, 1  ;;  %v315_v59 = vadd.f32 %v314_v56, %v313_v52  ;;  %v1292_v52 = vld [vmem:[%s2560_s2 + $0x2c0] sm:$0xff] }
 0x22d   :  { %484 = vmatpush.msra.mxu1 %v1295_v49  ;;  %v1288_v56 = vld [vmem:[%s2560_s2 + $0x2a0] sm:$0xff] }
 0x22e   :  { %v307_v63 = vadd.f32 %v306_v58, %v305_v55  ;;  %v316_v5 = vrot.slane %v315_v59, 1  ;;  %v1289_v55 = vld [vmem:[%s2560_s2 + $0x2a8] sm:$0xff]  ;;  %v1287_v58 = vld [vmem:[%s2560_s2 + $0x298] sm:$0xff] }
 0x22f   :  { %485 = vmatpush.msra.mxu1 %v1294_v50  ;;  %v1351_v50 = vld [vmem:[%s2560_s2 + $0x468] sm:$0xff] }
 0x230   :  { %v308_v7 = vmul.f32 0.0625, %v307_v63  ;;  %v317_v8 = vadd.f32 %v316_v5, %v315_v59  ;;  %v1311_v59 = vld [vmem:[%s2560_s2 + $0x358] sm:$0xff]  ;;  %v1285_v5 = vld [vmem:[%s2560_s2 + $0x288] sm:$0xff] }
 0x231   :  { %486 = vmatpush.msra.mxu1 %v1293_v51  ;;  %v1331_v63 = vld [vmem:[%s2560_s2 + $0x3f8] sm:$0xff] }
 0x232   :  { %v321_v14 = vmul.f32 %v308_v7, %v308_v7  ;;  %v318_v2 = vmul.f32 0.0625, %v317_v8  ;;  %v325_v20 = vmul.f32 %v308_v7, %v300_v53  ;;  %v1291_v53 = vld [vmem:[%s2560_s2 + $0x2b8] sm:$0xff]  ;;  %v1284_v7 = vld [vmem:[%s2560_s2 + $0x280] sm:$0xff] }
 0x233   :  { %487 = vmatpush.msra.mxu1 %v1292_v52  ;;  %v1308_v8 = vld [vmem:[%s2560_s2 + $0x340] sm:$0xff] }
 0x234   :  { %v322_v15 = vmul.f32 %v321_v14, %v320_v11  ;;  %v326_v23 = vperm.slane %v325_v20, 0  ;;  %v1330_v11 = vld [vmem:[%s2560_s2 + $0x3f0] sm:$0xff]  ;;  %v1329_v14 = vld [vmem:[%s2560_s2 + $0x3e8] sm:$0xff] }
 0x235   :  { %488 = vmatpush.msra.mxu1 %v1291_v53  ;;  %v1301_v20 = vld [vmem:[%s2560_s2 + $0x308] sm:$0xff]  ;;  %v1350_v53 = vld [vmem:[%s2560_s2 + $0x460] sm:$0xff] }
 0x236   :  { %v323_v16 = vsub.f32 %v318_v2, %v322_v15  ;;  %v327_v26 = vsub.f32 %v1840_v35, %v326_v23  ;;  %v328_v27 = vsub.f32 %v296_v39, %v326_v23  ;;  %v1328_v2 = vld [vmem:[%s2560_s2 + $0x3e0] sm:$0xff] }
 0x237   :  { %489 = vmatpush.msra.mxu1 %v1290_v54  ;;  %v1304_v15 = vld [vmem:[%s2560_s2 + $0x320] sm:$0xff] }
 0x238   :  { %v324_v17 = vmax.f32 %v323_v16, 0.0  ;;  %v330_v31 = vmul.f32 %v1478_v28, %v327_v26  ;;  %v331_v32 = vmul.f32 %v1478_v28, %v328_v27  ;;  %v1303_v16 = vld [vmem:[%s2560_s2 + $0x318] sm:$0xff]  ;;  %v1324_v23 = vld [vmem:[%s2560_s2 + $0x3c0] sm:$0xff]  ;;  %v1321_v26 = vld [vmem:[%s2560_s2 + $0x3a8] sm:$0xff] }
 0x239   :  { %490 = vmatpush.msra.mxu1 %v1289_v55  ;;  %v1320_v27 = vld [vmem:[%s2560_s2 + $0x3a0] sm:$0xff]  ;;  %v1319_v28 = vld [vmem:[%s2560_s2 + $0x398] sm:$0xff] }
 0x23a   :  { %v332_v18 = vadd.f32 1e-05, %v324_v17  ;;  %v1327_v17 = vld [vmem:[%s2560_s2 + $0x3d8] sm:$0xff] }
 0x23b   :  { %491 = vmatpush.msra.mxu1 %v1288_v56 }
 0x23c   :  { %1489 = vrsqrt.f32 %v332_v18  ;;  %vm339_vm2 = vweird.f32 %v332_v18 }
 0x23d   :  { %492 = vmatpush.msra.mxu1 %v1287_v58 }
 0x23f   :  { %493 = vmatpush.msra.mxu1 %v1286_v60 }
 0x241   :  { %494 = vmatpush.msra.mxu1 %v1285_v5  ;;  %v1347_v5 = vld [vmem:[%s2560_s2 + $0x448] sm:$0xff] }
 0x242   :  { %v1490_v19 = vpop.eup %1489 }
 0x243   :  { %v334_v21 = vmul.f32 %v1490_v19, %v332_v18  ;;  %vm340_vm1 = vweird.f32 %v1490_v19  ;;  %495 = vmatpush.msra.mxu1 %v1284_v7  ;;  %v1302_v18 = vld [vmem:[%s2560_s2 + $0x310] sm:$0xff] }
 0x244   :  { %vm341_vm3 = vmor %vm339_vm2, %vm340_vm1 }
 0x245   :  { %v335_v22 = vmul.f32 %v1490_v19, %v334_v21  ;;  %v1325_v21 = vld [vmem:[%s2560_s2 + $0x3c8] sm:$0xff]  ;;  %708 = vmatpush.msrb.mxu1 %v1353_v44 }
 0x247   :  { %v336_v24 = vmul.f32 0.5, %v335_v22  ;;  %v1300_v22 = vld [vmem:[%s2560_s2 + $0x300] sm:$0xff] }
 0x249   :  { %v337_v25 = vsub.f32 1.5, %v336_v24  ;;  %v1323_v24 = vld [vmem:[%s2560_s2 + $0x3b8] sm:$0xff] }
 0x24b   :  { %v338_v29 = vmul.f32 %v1490_v19, %v337_v25  ;;  %v1322_v25 = vld [vmem:[%s2560_s2 + $0x3b0] sm:$0xff] }
 0x24d   :  { %v342_v30 = vsel %vm341_vm3, %v1490_v19, %v338_v29  ;;  %v1326_v19 = vld [vmem:[%s2560_s2 + $0x3d0] sm:$0xff] }
 0x24e   :  { %v343_v33 = vperm.slane %v342_v30, 0  ;;  %v1318_v29 = vld [vmem:[%s2560_s2 + $0x390] sm:$0xff]  ;;  %v1317_v30 = vld [vmem:[%s2560_s2 + $0x388] sm:$0xff] }
 0x250   :  { %v345_v36 = vmul.f32 %v343_v33, %v331_v32  ;;  %v344_v37 = vmul.f32 %v343_v33, %v330_v31  ;;  %v1316_v31 = vld [vmem:[%s2560_s2 + $0x380] sm:$0xff] }
 0x252   :  { %v348_v38 = vadd.f32 %v1479_v34, %v345_v36  ;;  %v347_v35 = vadd.f32 %v1479_v34, %v344_v37 }
 0x254   :  { %vm350_vm4 = vcmp.gt.f32.partialorder %v348_v38, 0.0  ;;  %v352_v39 = vmul.f32 0.1, %v348_v38  ;;  %vm349_vm5 = vcmp.gt.f32.partialorder %v347_v35, 0.0  ;;  %v351_v40 = vmul.f32 0.1, %v347_v35 }
 0x256   :  { %v354_v41 = vsel %vm350_vm4, %v348_v38, %v352_v39  ;;  %v353_v42 = vsel %vm349_vm5, %v347_v35, %v351_v40 }
 0x257   :  { %369 = vmatpush.msra.mxu3 %v354_v41  ;;  %473 = vmatmul.f32.vlgmr.msra.gmra.mxu0 %v353_v42 }
 0x259   :  { %370 = vmatpush.msra.mxu3 %v353_v42 }
 0x25a   :  { %1262 = vmatmul.msk.f32.vlgmr.msra.gmra.mxu3 %vm38_vm0, %v1583_v1 }
 0x25b   :  { %526 = vmatpush.msrb.mxu3 %v1331_v63 }
 0x25d   :  { %527 = vmatpush.msrb.mxu3 %v1330_v11 }
 0x25f   :  { %476 = vmatmul.f32.gmra.mxu0 %v354_v41  ;;  %528 = vmatpush.msrb.mxu3 %v1329_v14  ;;  %v1480_v41 = vld [vmem:[%s2561_s3 + $0x4] ss:$0 sm:$0xff] }
 0x261   :  { %529 = vmatpush.msrb.mxu3 %v1328_v2  ;;  %v551_v2 = vld [vmem:[%s2561_s3 + $0x7] sm:$0x1] }
 0x262   :  { %1263 = vmatmul.msk.f32.gmra.mxu3 %vm38_vm0, %v1578_v0  ;;  %v1314_v0 = vld [vmem:[%s2560_s2 + $0x370] sm:$0xff] }
 0x263   :  { %504 = vmatpush.msra.mxu2 %v1314_v0  ;;  %530 = vmatpush.msrb.mxu3 %v1327_v17  ;;  %v1352_v0 = vld [vmem:[%s2560_s2 + $0x470] sm:$0xff] }
 0x264   :  { %709 = vmatpush.msrb.mxu1 %v1352_v0  ;;  %v1481_v0 = vld [vmem:[%s2561_s3 + $0x5] ss:$0 sm:$0xff] }
 0x265   :  { %505 = vmatpush.msra.mxu2 %v1313_v48  ;;  %531 = vmatpush.msrb.mxu3 %v1326_v19 }
 0x266   :  { %710 = vmatpush.msrb.mxu1 %v1351_v50 }
 0x267   :  { %506 = vmatpush.msra.mxu2 %v1312_v57  ;;  %532 = vmatpush.msrb.mxu3 %v1325_v21  ;;  %v1349_v57 = vld [vmem:[%s2560_s2 + $0x458] sm:$0xff]  ;;  %v570_v21 = vsub.f32 2.0, %v551_v2 }
 0x268   :  { %711 = vmatpush.msrb.mxu1 %v1350_v53 }
 0x269   :  { %507 = vmatpush.msra.mxu2 %v1311_v59  ;;  %533 = vmatpush.msrb.mxu3 %v1324_v23  ;;  %v1348_v59 = vld [vmem:[%s2560_s2 + $0x450] sm:$0xff] }
 0x26a   :  { %1264 = vmatmul.msk.f32.gmra.mxu3 %vm38_vm0, %v1609_v4  ;;  %712 = vmatpush.msrb.mxu1 %v1349_v57 }
 0x26b   :  { %508 = vmatpush.msra.mxu2 %v1310_v61  ;;  %534 = vmatpush.msrb.mxu3 %v1323_v24 }
 0x26c   :  { %713 = vmatpush.msrb.mxu1 %v1348_v59 }
 0x26d   :  { %509 = vmatpush.msra.mxu2 %v1309_v6  ;;  %535 = vmatpush.msrb.mxu3 %v1322_v25  ;;  %v1341_v25 = vld [vmem:[%s2560_s2 + $0x418] sm:$0xff] }
 0x26e   :  { %714 = vmatpush.msrb.mxu1 %v1347_v5  ;;  %v1368_v5 = vld [vmem:[%s2560_s2 + $0x4f0] sm:$0xff] }
 0x26f   :  { %510 = vmatpush.msra.mxu2 %v1308_v8  ;;  %536 = vmatpush.msrb.mxu3 %v1321_v26  ;;  %v1346_v8 = vld [vmem:[%s2560_s2 + $0x440] sm:$0xff] }
 0x270   :  { %715 = vmatpush.msrb.mxu1 %v1346_v8  ;;  %v1366_v8 = vld [vmem:[%s2560_s2 + $0x4e0] sm:$0xff] }
 0x271   :  { %511 = vmatpush.msra.mxu2 %v1307_v12  ;;  %537 = vmatpush.msrb.mxu3 %v1320_v27 }
 0x272   :  { %1265 = vmatmul.msk.f32.gmra.mxu3 %vm38_vm0, %v1625_v9 }
 0x273   :  { %512 = vmatpush.msra.mxu2 %v1306_v13  ;;  %538 = vmatpush.msrb.mxu3 %v1319_v28  ;;  %v1345_v13 = vld [vmem:[%s2560_s2 + $0x438] sm:$0xff]  ;;  %v571_v28 = vmul.f32 %v570_v21, %v551_v2 }
 0x274   :  { %716 = vmatpush.msrb.mxu1 %v1345_v13  ;;  %v1382_v13 = vld [vmem:[%s2560_s2 + $0x560] sm:$0xff]  ;;  %v1357_v21 = vld [vmem:[%s2560_s2 + $0x498] sm:$0xff] }
 0x275   :  { %513 = vmatpush.msra.mxu2 %v1305_v3  ;;  %539 = vmatpush.msrb.mxu3 %v1318_v29  ;;  %v1340_v29 = vld [vmem:[%s2560_s2 + $0x410] sm:$0xff] }
 0x277   :  { %514 = vmatpush.msra.mxu2 %v1304_v15  ;;  %540 = vmatpush.msrb.mxu3 %v1317_v30  ;;  %v1344_v15 = vld [vmem:[%s2560_s2 + $0x430] sm:$0xff]  ;;  %v1339_v30 = vld [vmem:[%s2560_s2 + $0x408] sm:$0xff] }
 0x278   :  { %717 = vmatpush.msrb.mxu1 %v1344_v15  ;;  %v1380_v15 = vld [vmem:[%s2560_s2 + $0x550] sm:$0xff] }
 0x279   :  { %515 = vmatpush.msra.mxu2 %v1303_v16  ;;  %541 = vmatpush.msrb.mxu3 %v1316_v31 }
 0x27a   :  { %1266 = vmatmul.msk.f32.gmra.mxu3 %vm38_vm0, %v1782_v62 }
 0x27b   :  { %516 = vmatpush.msra.mxu2 %v1302_v18  ;;  %v1343_v18 = vld [vmem:[%s2560_s2 + $0x428] sm:$0xff] }
 0x27c   :  { %718 = vmatpush.msrb.mxu1 %v1343_v18  ;;  %v1360_v18 = vld [vmem:[%s2560_s2 + $0x4b0] sm:$0xff] }
 0x27d   :  { %517 = vmatpush.msra.mxu2 %v1301_v20 }
 0x27f   :  { %518 = vmatpush.msra.mxu2 %v1300_v22  ;;  %v1342_v22 = vld [vmem:[%s2560_s2 + $0x420] sm:$0xff] }
 0x280   :  { %719 = vmatpush.msrb.mxu1 %v1342_v22  ;;  %v1356_v22 = vld [vmem:[%s2560_s2 + $0x490] sm:$0xff] }
 0x282   :  { %1267 = vmatmul.msk.f32.gmra.mxu3 %vm38_vm0, %v1798_v10  ;;  %720 = vmatpush.msrb.mxu1 %v1341_v25  ;;  %v1401_v25 = vld [vmem:[%s2560_s2 + $0x5f8] sm:$0xff] }
 0x284   :  { %721 = vmatpush.msrb.mxu1 %v1340_v29  ;;  %v1377_v29 = vld [vmem:[%s2560_s2 + $0x538] sm:$0xff] }
 0x286   :  { %722 = vmatpush.msrb.mxu1 %v1339_v30  ;;  %v1376_v30 = vld [vmem:[%s2560_s2 + $0x530] sm:$0xff] }
 0x2d4   :  { %v474_v35 = vpop.f32.mrf.mxu0 }
 0x2d5   :  { %v475_v45 = vadd.f32 %v1480_v41, %v474_v35 }
 0x2dc   :  { %v477_v42 = vpop.f32.mrf.mxu0 }
 0x2dd   :  { %v372_v32 = vpop.f32.mrf.mxu3  ;;  %v478_v47 = vadd.f32 %v1480_v41, %v477_v42 }
 0x2de   :  { %496 = vmatmul.f32.vlgmr.msra.gmra.mxu1 %v372_v32  ;;  %v1338_v32 = vld [vmem:[%s2560_s2 + $0x400] sm:$0xff] }
 0x2df   :  { %723 = vmatpush.msrb.mxu1 %v1338_v32  ;;  %v1375_v32 = vld [vmem:[%s2560_s2 + $0x528] sm:$0xff] }
 0x2e5   :  { %v375_v33 = vpop.f32.mrf.mxu3 }
 0x2e6   :  { %499 = vmatmul.f32.gmra.mxu1 %v375_v33 }
 0x2ed   :  { %v378_v34 = vpop.f32.mrf.mxu3 }
 0x2ee   :  { %519 = vmatmul.f32.vlgmr.msra.gmra.mxu2 %v378_v34 }
 0x2f5   :  { %v381_v36 = vpop.f32.mrf.mxu3 }
 0x2f6   :  { %522 = vmatmul.f32.gmra.mxu2 %v381_v36 }
 0x2fd   :  { %v384_v37 = vpop.f32.mrf.mxu3 }
 0x2fe   :  { %542 = vmatmul.f32.vlgmr.msrb.gmra.mxu3 %v384_v37 }
 0x305   :  { %v387_v38 = vpop.f32.mrf.mxu3 }
 0x306   :  { %545 = vmatmul.f32.gmra.mxu3 %v387_v38 }
 0x35b   :  { %v497_v39 = vpop.f32.mrf.mxu1 }
 0x35c   :  { %v498_v48 = vadd.f32 %v497_v39, %v475_v45 }
 0x363   :  { %v500_v46 = vpop.f32.mrf.mxu1 }
 0x364   :  { %v501_v51 = vadd.f32 %v500_v46, %v478_v47 }
 0x371   :  { %v520_v40 = vpop.f32.mrf.mxu2 }
 0x372   :  { %v521_v52 = vadd.f32 %v520_v40, %v498_v48 }
 0x379   :  { %v523_v49 = vpop.f32.mrf.mxu2 }
 0x37a   :  { %v524_v54 = vadd.f32 %v523_v49, %v501_v51 }
 0x381   :  { %v543_v43 = vpop.f32.mrf.mxu3 }
 0x382   :  { %v2062_v55 = vadd.f32 %v543_v43, %v521_v52  ;;  %v1482_v52 = vld [vmem:[%s2561_s3 + $0x6] ss:$0 sm:$0xff] }
 0x384   :  { %v560_v60 = vmul.f32 %v2062_v55, %v2062_v55 }
 0x389   :  { %v546_v56 = vpop.f32.mrf.mxu3 }
 0x38a   :  { %v547_v58 = vadd.f32 %v546_v56, %v524_v54 }
 0x38c   :  { %v552_v61 = vadd.f32 %v547_v58, %v2062_v55  ;;  %v561_v63 = vmul.f32 %v547_v58, %v547_v58 }
 0x38e   :  { %v553_v6 = vrot.slane %v552_v61, 4  ;;  %v562_v7 = vadd.f32 %v561_v63, %v560_v60  ;;  %v1369_v63 = vld [vmem:[%s2560_s2 + $0x4f8] sm:$0xff] }
 0x38f   :  { %731 = vmatpush.msrb.mxu2 %v1369_v63 }
 0x390   :  { %v554_v11 = vadd.f32 %v553_v6, %v552_v61  ;;  %v563_v12 = vrot.slane %v562_v7, 4  ;;  %v2118_v61 = vld [vmem:[%s2558_s0 + $0x8] sm:$0xff]  ;;  %v1385_v6 = vld [vmem:[%s2560_s2 + $0x578] sm:$0xff] }
 0x391   :  { %732 = vmatpush.msrb.mxu2 %v1368_v5  ;;  %754 = vmatpush.msra.mxu3 %v1385_v6  ;;  %v1423_v5 = vld [vmem:[%s2560_s2 + $0x678] sm:$0xff] }
 0x392   :  { %v555_v14 = vrot.slane %v554_v11, 2  ;;  %v564_v3 = vadd.f32 %v563_v12, %v562_v7  ;;  %v1384_v7 = vld [vmem:[%s2560_s2 + $0x570] sm:$0xff]  ;;  %v1365_v12 = vld [vmem:[%s2560_s2 + $0x4d8] sm:$0xff] }
 0x393   :  { %755 = vmatpush.msra.mxu3 %v1384_v7  ;;  %v1422_v7 = vld [vmem:[%s2560_s2 + $0x670] sm:$0xff] }
 0x394   :  { %v556_v16 = vadd.f32 %v555_v14, %v554_v11  ;;  %v565_v17 = vrot.slane %v564_v3, 2  ;;  %v1383_v11 = vld [vmem:[%s2560_s2 + $0x568] sm:$0xff]  ;;  %v1364_v14 = vld [vmem:[%s2560_s2 + $0x4d0] sm:$0xff] }
 0x395   :  { %756 = vmatpush.msra.mxu3 %v1383_v11 }
 0x396   :  { %v557_v19 = vrot.slane %v556_v16, 1  ;;  %v566_v20 = vadd.f32 %v565_v17, %v564_v3  ;;  %v1381_v3 = vld [vmem:[%s2560_s2 + $0x558] sm:$0xff] }
 0x397   :  { %757 = vmatpush.msra.mxu3 %v1382_v13  ;;  %v1361_v17 = vld [vmem:[%s2560_s2 + $0x4b8] sm:$0xff]  ;;  %v1421_v13 = vld [vmem:[%s2560_s2 + $0x668] sm:$0xff] }
 0x398   :  { %v558_v23 = vadd.f32 %v557_v19, %v556_v16  ;;  %v567_v24 = vrot.slane %v566_v20, 1  ;;  %v1362_v16 = vld [vmem:[%s2560_s2 + $0x4c0] sm:$0xff]  ;;  %v1359_v19 = vld [vmem:[%s2560_s2 + $0x4a8] sm:$0xff] }
 0x399   :  { %758 = vmatpush.msra.mxu3 %v1381_v3 }
 0x39a   :  { %v559_v26 = vmul.f32 0.0625, %v558_v23  ;;  %v568_v27 = vadd.f32 %v567_v24, %v566_v20  ;;  %v1358_v20 = vld [vmem:[%s2560_s2 + $0x4a0] sm:$0xff]  ;;  %v1355_v23 = vld [vmem:[%s2560_s2 + $0x488] sm:$0xff] }
 0x39b   :  { %759 = vmatpush.msra.mxu3 %v1380_v15  ;;  %v1379_v24 = vld [vmem:[%s2560_s2 + $0x548] sm:$0xff] }
 0x39c   :  { %v572_v31 = vmul.f32 %v559_v26, %v559_v26  ;;  %v569_v33 = vmul.f32 0.0625, %v568_v27  ;;  %v576_v39 = vmul.f32 %v559_v26, %v551_v2  ;;  %v1363_v2 = vld [vmem:[%s2560_s2 + $0x4c8] sm:$0xff]  ;;  %v1354_v26 = vld [vmem:[%s2560_s2 + $0x480] sm:$0xff] }
 0x39d   :  { %760 = vmatpush.msra.mxu3 %v1379_v24  ;;  %v1378_v27 = vld [vmem:[%s2560_s2 + $0x540] sm:$0xff]  ;;  %v1417_v24 = vld [vmem:[%s2560_s2 + $0x648] sm:$0xff] }
 0x39e   :  { %v573_v34 = vmul.f32 %v572_v31, %v571_v28  ;;  %v577_v42 = vperm.slane %v576_v39, 0  ;;  %v1400_v28 = vld [vmem:[%s2560_s2 + $0x5f0] sm:$0xff]  ;;  %v1399_v31 = vld [vmem:[%s2560_s2 + $0x5e8] sm:$0xff] }
 0x39f   :  { %761 = vmatpush.msra.mxu3 %v1378_v27  ;;  %v1371_v39 = vld [vmem:[%s2560_s2 + $0x508] sm:$0xff]  ;;  %v1416_v27 = vld [vmem:[%s2560_s2 + $0x640] sm:$0xff] }
 0x3a0   :  { %v574_v36 = vsub.f32 %v569_v33, %v573_v34  ;;  %v578_v45 = vsub.f32 %v2062_v55, %v577_v42  ;;  %v579_v46 = vsub.f32 %v547_v58, %v577_v42  ;;  %v1398_v33 = vld [vmem:[%s2560_s2 + $0x5e0] sm:$0xff] }
 0x3a1   :  { %762 = vmatpush.msra.mxu3 %v1377_v29  ;;  %v1374_v34 = vld [vmem:[%s2560_s2 + $0x520] sm:$0xff] }
 0x3a2   :  { %v575_v37 = vmax.f32 %v574_v36, 0.0  ;;  %v581_v49 = vmul.f32 %v1481_v0, %v578_v45  ;;  %v582_v50 = vmul.f32 %v1481_v0, %v579_v46  ;;  %v1373_v36 = vld [vmem:[%s2560_s2 + $0x518] sm:$0xff]  ;;  %v1394_v42 = vld [vmem:[%s2560_s2 + $0x5c0] sm:$0xff]  ;;  %v1391_v45 = vld [vmem:[%s2560_s2 + $0x5a8] sm:$0xff] }
 0x3a3   :  { %763 = vmatpush.msra.mxu3 %v1376_v30  ;;  %v1390_v46 = vld [vmem:[%s2560_s2 + $0x5a0] sm:$0xff]  ;;  %v1389_v0 = vld [vmem:[%s2560_s2 + $0x598] sm:$0xff] }
 0x3a4   :  { %v583_v38 = vadd.f32 1e-05, %v575_v37  ;;  %v1397_v37 = vld [vmem:[%s2560_s2 + $0x5d8] sm:$0xff] }
 0x3a5   :  { %764 = vmatpush.msra.mxu3 %v1375_v32  ;;  %v1415_v30 = vld [vmem:[%s2560_s2 + $0x638] sm:$0xff] }
 0x3a6   :  { %1491 = vrsqrt.f32 %v583_v38  ;;  %vm590_vm7 = vweird.f32 %v583_v38 }
 0x3a7   :  { %765 = vmatpush.msra.mxu3 %v1374_v34  ;;  %v1414_v34 = vld [vmem:[%s2560_s2 + $0x630] sm:$0xff] }
 0x3a9   :  { %766 = vmatpush.msra.mxu3 %v1373_v36 }
 0x3ac   :  { %v1492_v35 = vpop.eup %1491 }
 0x3ad   :  { %v585_v40 = vmul.f32 %v1492_v35, %v583_v38  ;;  %vm591_vm6 = vweird.f32 %v1492_v35  ;;  %v1372_v38 = vld [vmem:[%s2560_s2 + $0x510] sm:$0xff] }
 0x3ae   :  { %vm592_vm8 = vmor %vm590_vm7, %vm591_vm6  ;;  %767 = vmatpush.msra.mxu3 %v1372_v38  ;;  %v1413_v38 = vld [vmem:[%s2560_s2 + $0x628] sm:$0xff]  ;;  %vm1158_vm7 = vcmask 1040384  }
 0x3af   :  { %v586_v41 = vmul.f32 %v1492_v35, %v585_v40  ;;  %v1395_v40 = vld [vmem:[%s2560_s2 + $0x5c8] sm:$0xff] }
 0x3b0   :  { %768 = vmatpush.msra.mxu3 %v1371_v39 }
 0x3b1   :  { %v587_v43 = vmul.f32 0.5, %v586_v41  ;;  %v1370_v41 = vld [vmem:[%s2560_s2 + $0x500] sm:$0xff] }
 0x3b2   :  { %769 = vmatpush.msra.mxu3 %v1370_v41  ;;  %v1412_v41 = vld [vmem:[%s2560_s2 + $0x620] sm:$0xff] }
 0x3b3   :  { %v588_v44 = vsub.f32 1.5, %v587_v43  ;;  %v1393_v43 = vld [vmem:[%s2560_s2 + $0x5b8] sm:$0xff] }
 0x3b5   :  { %v589_v47 = vmul.f32 %v1492_v35, %v588_v44  ;;  %v1392_v44 = vld [vmem:[%s2560_s2 + $0x5b0] sm:$0xff] }
 0x3b7   :  { %v593_v48 = vsel %vm592_vm8, %v1492_v35, %v589_v47  ;;  %v1396_v35 = vld [vmem:[%s2560_s2 + $0x5d0] sm:$0xff] }
 0x3b8   :  { %v594_v51 = vperm.slane %v593_v48, 0  ;;  %v1388_v47 = vld [vmem:[%s2560_s2 + $0x590] sm:$0xff]  ;;  %v1387_v48 = vld [vmem:[%s2560_s2 + $0x588] sm:$0xff] }
 0x3ba   :  { %v596_v53 = vmul.f32 %v594_v51, %v582_v50  ;;  %v595_v54 = vmul.f32 %v594_v51, %v581_v49  ;;  %v1386_v49 = vld [vmem:[%s2560_s2 + $0x580] sm:$0xff] }
 0x3bc   :  { %v599_v56 = vadd.f32 %v1482_v52, %v596_v53  ;;  %v598_v55 = vadd.f32 %v1482_v52, %v595_v54 }
 0x3be   :  { %vm601_vm9 = vcmp.gt.f32.partialorder %v599_v56, 0.0  ;;  %v603_v57 = vmul.f32 0.1, %v599_v56  ;;  %vm600_vm10 = vcmp.gt.f32.partialorder %v598_v55, 0.0  ;;  %v602_v58 = vmul.f32 0.1, %v598_v55 }
 0x3c0   :  { %v605_v59 = vsel %vm601_vm9, %v599_v56, %v603_v57  ;;  %v604_v60 = vsel %vm600_vm10, %v598_v55, %v602_v58 }
 0x3c1   :  { %620 = vmatpush.msrb.mxu0 %v605_v59  ;;  %724 = vmatmul.f32.vlgmr.msrb.gmra.mxu1 %v604_v60 }
 0x3c3   :  { %621 = vmatpush.msrb.mxu0 %v604_v60 }
 0x3c4   :  { %1332 = vmatmul.msk.f32.vlgmr.msrb.gmra.mxu0 %vm38_vm0, %v1583_v1  ;;  %v1367_v1 = vld [vmem:[%s2560_s2 + $0x4e8] sm:$0xff] }
 0x3c5   :  { %733 = vmatpush.msrb.mxu2 %v1367_v1  ;;  %777 = vmatpush.msra.mxu0 %v1401_v25 }
 0x3c7   :  { %734 = vmatpush.msrb.mxu2 %v1366_v8  ;;  %778 = vmatpush.msra.mxu0 %v1400_v28 }
 0x3c9   :  { %727 = vmatmul.f32.gmra.mxu1 %v605_v59  ;;  %735 = vmatpush.msrb.mxu2 %v1365_v12  ;;  %v1483_v59 = vld [vmem:[%s2561_s3 + $0x8] ss:$0 sm:$0xff] }
 0x3ca   :  { %779 = vmatpush.msra.mxu0 %v1399_v31 }
 0x3cb   :  { %736 = vmatpush.msrb.mxu2 %v1364_v14 }
 0x3cc   :  { %1333 = vmatmul.msk.f32.gmra.mxu0 %vm38_vm0, %v2118_v61 }
 0x3cd   :  { %737 = vmatpush.msrb.mxu2 %v1363_v2  ;;  %780 = vmatpush.msra.mxu0 %v1398_v33  ;;  %v1420_v2 = vld [vmem:[%s2560_s2 + $0x660] sm:$0xff]  ;;  %v802_v33 = vld [vmem:[%s2561_s3 + $0xb] sm:$0x1] }
 0x3cf   :  { %738 = vmatpush.msrb.mxu2 %v1362_v16  ;;  %781 = vmatpush.msra.mxu0 %v1397_v37 }
 0x3d1   :  { %739 = vmatpush.msrb.mxu2 %v1361_v17  ;;  %782 = vmatpush.msra.mxu0 %v1396_v35 }
 0x3d3   :  { %740 = vmatpush.msrb.mxu2 %v1360_v18  ;;  %783 = vmatpush.msra.mxu0 %v1395_v40  ;;  %v1419_v18 = vld [vmem:[%s2560_s2 + $0x658] sm:$0xff]  ;;  %v821_v40 = vsub.f32 2.0, %v802_v33 }
 0x3d4   :  { %1334 = vmatmul.msk.f32.gmra.mxu0 %vm38_vm0, %v1609_v4 }
 0x3d5   :  { %741 = vmatpush.msrb.mxu2 %v1359_v19  ;;  %784 = vmatpush.msra.mxu0 %v1394_v42 }
 0x3d7   :  { %742 = vmatpush.msrb.mxu2 %v1358_v20  ;;  %785 = vmatpush.msra.mxu0 %v1393_v43  ;;  %v1418_v20 = vld [vmem:[%s2560_s2 + $0x650] sm:$0xff] }
 0x3d9   :  { %743 = vmatpush.msrb.mxu2 %v1357_v21  ;;  %786 = vmatpush.msra.mxu0 %v1392_v44  ;;  %v1411_v44 = vld [vmem:[%s2560_s2 + $0x618] sm:$0xff] }
 0x3db   :  { %744 = vmatpush.msrb.mxu2 %v1356_v22  ;;  %787 = vmatpush.msra.mxu0 %v1391_v45 }
 0x3dc   :  { %1335 = vmatmul.msk.f32.gmra.mxu0 %vm38_vm0, %v1625_v9 }
 0x3dd   :  { %745 = vmatpush.msrb.mxu2 %v1355_v23  ;;  %788 = vmatpush.msra.mxu0 %v1390_v46 }
 0x3df   :  { %746 = vmatpush.msrb.mxu2 %v1354_v26  ;;  %789 = vmatpush.msra.mxu0 %v1389_v0  ;;  %v822_v0 = vmul.f32 %v821_v40, %v802_v33  ;;  %v1428_v40 = vld [vmem:[%s2560_s2 + $0x6a0] sm:$0xff] }
 0x3e1   :  { %790 = vmatpush.msra.mxu0 %v1388_v47  ;;  %959 = vmatpush.msra.mxu2 %v1423_v5  ;;  %v1410_v47 = vld [vmem:[%s2560_s2 + $0x610] sm:$0xff] }
 0x3e3   :  { %791 = vmatpush.msra.mxu0 %v1387_v48  ;;  %960 = vmatpush.msra.mxu2 %v1422_v7  ;;  %v1409_v48 = vld [vmem:[%s2560_s2 + $0x608] sm:$0xff] }
 0x3e4   :  { %1336 = vmatmul.msk.f32.gmra.mxu0 %vm38_vm0, %v1782_v62  ;;  %v1484_v7 = vld [vmem:[%s2561_s3 + $0x9] ss:$0 sm:$0xff] }
 0x3e5   :  { %792 = vmatpush.msra.mxu0 %v1386_v49  ;;  %961 = vmatpush.msra.mxu2 %v1421_v13 }
 0x3e7   :  { %962 = vmatpush.msra.mxu2 %v1420_v2 }
 0x3e9   :  { %963 = vmatpush.msra.mxu2 %v1419_v18 }
 0x3eb   :  { %964 = vmatpush.msra.mxu2 %v1418_v20 }
 0x3ec   :  { %1337 = vmatmul.msk.f32.gmra.mxu0 %vm38_vm0, %v1798_v10 }
 0x3ed   :  { %965 = vmatpush.msra.mxu2 %v1417_v24  ;;  %v1438_v24 = vld [vmem:[%s2560_s2 + $0x6f0] sm:$0xff] }
 0x3ef   :  { %966 = vmatpush.msra.mxu2 %v1416_v27  ;;  %v1436_v27 = vld [vmem:[%s2560_s2 + $0x6e0] sm:$0xff] }
 0x3f1   :  { %967 = vmatpush.msra.mxu2 %v1415_v30  ;;  %v1452_v30 = vld [vmem:[%s2560_s2 + $0x760] sm:$0xff] }
 0x3f3   :  { %968 = vmatpush.msra.mxu2 %v1414_v34  ;;  %v1433_v34 = vld [vmem:[%s2560_s2 + $0x6c8] sm:$0xff] }
 0x3f5   :  { %969 = vmatpush.msra.mxu2 %v1413_v38  ;;  %v1431_v38 = vld [vmem:[%s2560_s2 + $0x6b8] sm:$0xff] }
 0x3f7   :  { %970 = vmatpush.msra.mxu2 %v1412_v41  ;;  %v1426_v41 = vld [vmem:[%s2560_s2 + $0x690] sm:$0xff] }
 0x3f9   :  { %971 = vmatpush.msra.mxu2 %v1411_v44  ;;  %v1470_v44 = vld [vmem:[%s2560_s2 + $0x7f0] sm:$0xff] }
 0x3fb   :  { %972 = vmatpush.msra.mxu2 %v1410_v47  ;;  %v1468_v47 = vld [vmem:[%s2560_s2 + $0x7e0] sm:$0xff] }
 0x3fd   :  { %973 = vmatpush.msra.mxu2 %v1409_v48  ;;  %v1444_v48 = vld [vmem:[%s2560_s2 + $0x720] sm:$0xff] }
 0x43e   :  { %v725_v55 = vpop.f32.mrf.mxu1 }
 0x43f   :  { %v726_v1 = vadd.f32 %v1483_v59, %v725_v55 }
 0x441   :  { %v623_v50 = vpop.f32.mrf.mxu0 }
 0x442   :  { %747 = vmatmul.f32.vlgmr.msrb.gmra.mxu2 %v623_v50  ;;  %v1408_v50 = vld [vmem:[%s2560_s2 + $0x600] sm:$0xff] }
 0x443   :  { %974 = vmatpush.msra.mxu2 %v1408_v50  ;;  %v1467_v50 = vld [vmem:[%s2560_s2 + $0x7d8] sm:$0xff] }
 0x446   :  { %v728_v60 = vpop.f32.mrf.mxu1 }
 0x447   :  { %v729_v8 = vadd.f32 %v1483_v59, %v728_v60 }
 0x449   :  { %v626_v51 = vpop.f32.mrf.mxu0 }
 0x44a   :  { %750 = vmatmul.f32.gmra.mxu2 %v626_v51 }
 0x451   :  { %v629_v52 = vpop.f32.mrf.mxu0 }
 0x452   :  { %770 = vmatmul.f32.vlgmr.msra.gmra.mxu3 %v629_v52 }
 0x459   :  { %v632_v53 = vpop.f32.mrf.mxu0 }
 0x45a   :  { %773 = vmatmul.f32.gmra.mxu3 %v632_v53 }
 0x461   :  { %v635_v54 = vpop.f32.mrf.mxu0 }
 0x462   :  { %793 = vmatmul.f32.vlgmr.msra.gmra.mxu0 %v635_v54 }
 0x469   :  { %v638_v56 = vpop.f32.mrf.mxu0 }
 0x46a   :  { %796 = vmatmul.f32.gmra.mxu0 %v638_v56 }
 0x4c5   :  { %v748_v57 = vpop.f32.mrf.mxu2 }
 0x4c6   :  { %v749_v11 = vadd.f32 %v748_v57, %v726_v1 }
 0x4cd   :  { %v751_v6 = vpop.f32.mrf.mxu2 }
 0x4ce   :  { %v752_v14 = vadd.f32 %v751_v6, %v729_v8 }
 0x4d5   :  { %v771_v58 = vpop.f32.mrf.mxu3 }
 0x4d6   :  { %v772_v3 = vadd.f32 %v771_v58, %v749_v11 }
 0x4dd   :  { %v774_v12 = vpop.f32.mrf.mxu3 }
 0x4de   :  { %v775_v15 = vadd.f32 %v774_v12, %v752_v14 }
 0x4df   :  { %v794_v63 = vpop.f32.mrf.mxu0 }
 0x4e0   :  { %v2289_v16 = vadd.f32 %v794_v63, %v772_v3  ;;  %v1485_v3 = vld [vmem:[%s2561_s3 + $0xa] ss:$0 sm:$0xff] }
 0x4e2   :  { %v811_v21 = vmul.f32 %v2289_v16, %v2289_v16 }
 0x4e7   :  { %v797_v17 = vpop.f32.mrf.mxu0 }
 0x4e8   :  { %v798_v19 = vadd.f32 %v797_v17, %v775_v15 }
 0x4ea   :  { %v803_v22 = vadd.f32 %v798_v19, %v2289_v16  ;;  %v812_v23 = vmul.f32 %v798_v19, %v798_v19 }
 0x4ec   :  { %v804_v25 = vrot.slane %v803_v22, 4  ;;  %v813_v26 = vadd.f32 %v812_v23, %v811_v21  ;;  %v1439_v23 = vld [vmem:[%s2560_s2 + $0x6f8] sm:$0xff] }
 0x4ed   :  { %982 = vmatpush.msrb.mxu3 %v1439_v23 }
 0x4ee   :  { %v805_v28 = vadd.f32 %v804_v25, %v803_v22  ;;  %v814_v29 = vrot.slane %v813_v26, 4  ;;  %v1510_v22 = vld [vmem:[%s2558_s0] sm:$0xff]  ;;  %v1437_v25 = vld [vmem:[%s2560_s2 + $0x6e8] sm:$0xff] }
 0x4ef   :  { %983 = vmatpush.msrb.mxu3 %v1438_v24 }
 0x4f0   :  { %v806_v31 = vrot.slane %v805_v28, 2  ;;  %v815_v32 = vadd.f32 %v814_v29, %v813_v26  ;;  %v1455_v26 = vld [vmem:[%s2560_s2 + $0x778] sm:$0xff] }
 0x4f1   :  { %1005 = vmatpush.msrb.mxu0 %v1455_v26  ;;  %984 = vmatpush.msrb.mxu3 %v1437_v25  ;;  %v1435_v29 = vld [vmem:[%s2560_s2 + $0x6d8] sm:$0xff] }
 0x4f2   :  { %v807_v36 = vadd.f32 %v806_v31, %v805_v28  ;;  %v816_v37 = vrot.slane %v815_v32, 2  ;;  %v1453_v28 = vld [vmem:[%s2560_s2 + $0x768] sm:$0xff]  ;;  %v1471_v31 = vld [vmem:[%s2560_s2 + $0x7f8] sm:$0xff] }
 0x4f3   :  { %985 = vmatpush.msrb.mxu3 %v1436_v27 }
 0x4f4   :  { %v808_v35 = vrot.slane %v807_v36, 1  ;;  %v817_v39 = vadd.f32 %v816_v37, %v815_v32  ;;  %v1434_v32 = vld [vmem:[%s2560_s2 + $0x6d0] sm:$0xff]  ;;  %v1449_v37 = vld [vmem:[%s2560_s2 + $0x748] sm:$0xff] }
 0x4f5   :  { %986 = vmatpush.msrb.mxu3 %v1435_v29 }
 0x4f6   :  { %v809_v42 = vadd.f32 %v808_v35, %v807_v36  ;;  %v818_v43 = vrot.slane %v817_v39, 1  ;;  %v1432_v36 = vld [vmem:[%s2560_s2 + $0x6c0] sm:$0xff]  ;;  %v1430_v35 = vld [vmem:[%s2560_s2 + $0x6b0] sm:$0xff] }
 0x4f7   :  { %987 = vmatpush.msrb.mxu3 %v1434_v32 }
 0x4f8   :  { %v810_v45 = vmul.f32 0.0625, %v809_v42  ;;  %v819_v46 = vadd.f32 %v818_v43, %v817_v39  ;;  %v1429_v39 = vld [vmem:[%s2560_s2 + $0x6a8] sm:$0xff]  ;;  %v1424_v43 = vld [vmem:[%s2560_s2 + $0x680] sm:$0xff] }
 0x4f9   :  { %988 = vmatpush.msrb.mxu3 %v1433_v34  ;;  %v1425_v42 = vld [vmem:[%s2560_s2 + $0x688] sm:$0xff] }
 0x4fa   :  { %v823_v49 = vmul.f32 %v810_v45, %v810_v45  ;;  %v820_v51 = vmul.f32 0.0625, %v819_v46  ;;  %v827_v57 = vmul.f32 %v810_v45, %v802_v33  ;;  %v1451_v33 = vld [vmem:[%s2560_s2 + $0x758] sm:$0xff]  ;;  %v1469_v46 = vld [vmem:[%s2560_s2 + $0x7e8] sm:$0xff] }
 0x4fb   :  { %989 = vmatpush.msrb.mxu3 %v1432_v36  ;;  %v1447_v45 = vld [vmem:[%s2560_s2 + $0x738] sm:$0xff] }
 0x4fc   :  { %v824_v52 = vmul.f32 %v823_v49, %v822_v0  ;;  %v828_v60 = vperm.slane %v827_v57, 0  ;;  %v1445_v0 = vld [vmem:[%s2560_s2 + $0x728] sm:$0xff]  ;;  %v1443_v49 = vld [vmem:[%s2560_s2 + $0x718] sm:$0xff] }
 0x4fd   :  { %990 = vmatpush.msrb.mxu3 %v1431_v38  ;;  %v1463_v57 = vld [vmem:[%s2560_s2 + $0x7b8] sm:$0xff]  ;;  %v1053_v38 = vld [vmem:[%s2561_s3 + $0xf] sm:$0x1] }
 0x4fe   :  { %v825_v53 = vsub.f32 %v820_v51, %v824_v52  ;;  %v829_v1 = vsub.f32 %v2289_v16, %v828_v60  ;;  %v830_v6 = vsub.f32 %v798_v19, %v828_v60  ;;  %v1442_v51 = vld [vmem:[%s2560_s2 + $0x710] sm:$0xff]  ;;  %v1460_v60 = vld [vmem:[%s2560_s2 + $0x7a0] sm:$0xff] }
 0x4ff   :  { %991 = vmatpush.msrb.mxu3 %v1430_v35  ;;  %v1466_v52 = vld [vmem:[%s2560_s2 + $0x7d0] sm:$0xff] }
 0x500   :  { %v826_v54 = vmax.f32 %v825_v53, 0.0  ;;  %v832_v12 = vmul.f32 %v1484_v7, %v829_v1  ;;  %v833_v13 = vmul.f32 %v1484_v7, %v830_v6  ;;  %v1441_v53 = vld [vmem:[%s2560_s2 + $0x708] sm:$0xff]  ;;  %v1456_v6 = vld [vmem:[%s2560_s2 + $0x780] sm:$0xff] }
 0x501   :  { %992 = vmatpush.msrb.mxu3 %v1429_v39  ;;  %v1457_v1 = vld [vmem:[%s2560_s2 + $0x788] sm:$0xff] }
 0x502   :  { %v834_v56 = vadd.f32 1e-05, %v826_v54  ;;  %v1465_v54 = vld [vmem:[%s2560_s2 + $0x7c8] sm:$0xff] }
 0x503   :  { %993 = vmatpush.msrb.mxu3 %v1428_v40  ;;  %v1130_v40 = vld [vmem:[#allocation2 + $0x78] sm:$0xff] }
 0x504   :  { %1493 = vrsqrt.f32 %v834_v56  ;;  %vm841_vm12 = vweird.f32 %v834_v56  ;;  %1132 = vmatpush.msrb.mxu2 %v1130_v40 }
 0x50a   :  { %v1494_v55 = vpop.eup %1493 }
 0x50b   :  { %v836_v58 = vmul.f32 %v1494_v55, %v834_v56  ;;  %vm842_vm11 = vweird.f32 %v1494_v55  ;;  %v1440_v56 = vld [vmem:[%s2560_s2 + $0x700] sm:$0xff] }
 0x50c   :  { %vm843_vm13 = vmor %vm841_vm12, %vm842_vm11 }
 0x50d   :  { %v837_v59 = vmul.f32 %v1494_v55, %v836_v58  ;;  %v1462_v58 = vld [vmem:[%s2560_s2 + $0x7b0] sm:$0xff] }
 0x50f   :  { %v838_v63 = vmul.f32 0.5, %v837_v59  ;;  %v1461_v59 = vld [vmem:[%s2560_s2 + $0x7a8] sm:$0xff] }
 0x511   :  { %v839_v5 = vsub.f32 1.5, %v838_v63  ;;  %v1459_v63 = vld [vmem:[%s2560_s2 + $0x798] sm:$0xff] }
 0x513   :  { %v840_v8 = vmul.f32 %v1494_v55, %v839_v5  ;;  %v1458_v5 = vld [vmem:[%s2560_s2 + $0x790] sm:$0xff] }
 0x515   :  { %v844_v11 = vsel %vm843_vm13, %v1494_v55, %v840_v8  ;;  %v1464_v55 = vld [vmem:[%s2560_s2 + $0x7c0] sm:$0xff] }
 0x516   :  { %v845_v14 = vperm.slane %v844_v11, 0 }
 0x518   :  { %v847_v2 = vmul.f32 %v845_v14, %v833_v13  ;;  %v846_v15 = vmul.f32 %v845_v14, %v832_v12 }
 0x51a   :  { %v850_v17 = vadd.f32 %v1485_v3, %v847_v2  ;;  %v849_v16 = vadd.f32 %v1485_v3, %v846_v15 }
 0x51c   :  { %vm852_vm14 = vcmp.gt.f32.partialorder %v850_v17, 0.0  ;;  %v854_v18 = vmul.f32 0.1, %v850_v17  ;;  %vm851_vm15 = vcmp.gt.f32.partialorder %v849_v16, 0.0  ;;  %v853_v19 = vmul.f32 0.1, %v849_v16 }
 0x51e   :  { %v856_v20 = vsel %vm852_vm14, %v850_v17, %v854_v18  ;;  %v855_v21 = vsel %vm851_vm15, %v849_v16, %v853_v19  ;;  %v1486_v17 = vld [vmem:[%s2561_s3 + $0xc] ss:$0 sm:$0xff] }
 0x51f   :  { %871 = vmatpush.msra.mxu1 %v856_v20  ;;  %975 = vmatmul.f32.vlgmr.msra.gmra.mxu2 %v855_v21 }
 0x521   :  { %872 = vmatpush.msra.mxu1 %v855_v21 }
 0x522   :  { %1402 = vmatmul.msk.f32.vlgmr.msra.gmra.mxu1 %vm38_vm0, %v1510_v22 }
 0x523   :  { %1028 = vmatpush.msrb.mxu1 %v1471_v31 }
 0x525   :  { %1029 = vmatpush.msrb.mxu1 %v1470_v44 }
 0x527   :  { %978 = vmatmul.f32.gmra.mxu2 %v856_v20  ;;  %1030 = vmatpush.msrb.mxu1 %v1469_v46 }
 0x529   :  { %1031 = vmatpush.msrb.mxu1 %v1468_v47  ;;  %v1127_v47 = vld [vmem:[#allocation2 + $0x60] sm:$0xff] }
 0x52a   :  { %1403 = vmatmul.msk.f32.gmra.mxu1 %vm38_vm0, %v2118_v61  ;;  %v1454_v61 = vld [vmem:[%s2560_s2 + $0x770] sm:$0xff] }
 0x52b   :  { %1006 = vmatpush.msrb.mxu0 %v1454_v61  ;;  %1032 = vmatpush.msrb.mxu1 %v1467_v50 }
 0x52d   :  { %1007 = vmatpush.msrb.mxu0 %v1453_v28  ;;  %1033 = vmatpush.msrb.mxu1 %v1466_v52  ;;  %v1125_v52 = vld [vmem:[#allocation2 + $0x50] sm:$0xff] }
 0x52f   :  { %1008 = vmatpush.msrb.mxu0 %v1452_v30  ;;  %1034 = vmatpush.msrb.mxu1 %v1465_v54  ;;  %v1124_v54 = vld [vmem:[#allocation2 + $0x48] sm:$0xff] }
 0x531   :  { %1009 = vmatpush.msrb.mxu0 %v1451_v33  ;;  %1035 = vmatpush.msrb.mxu1 %v1464_v55 }
 0x532   :  { %1404 = vmatmul.msk.f32.gmra.mxu1 %vm38_vm0, %v1609_v4  ;;  %v1450_v4 = vld [vmem:[%s2560_s2 + $0x750] sm:$0xff] }
 0x533   :  { %1010 = vmatpush.msrb.mxu0 %v1450_v4  ;;  %1036 = vmatpush.msrb.mxu1 %v1463_v57  ;;  %v1122_v57 = vld [vmem:[#allocation2 + $0x38] sm:$0xff] }
 0x535   :  { %1011 = vmatpush.msrb.mxu0 %v1449_v37  ;;  %1037 = vmatpush.msrb.mxu1 %v1462_v58 }
 0x537   :  { %1038 = vmatpush.msrb.mxu1 %v1461_v59  ;;  %v1121_v59 = vld [vmem:[#allocation2 + $0x30] sm:$0xff] }
 0x539   :  { %1039 = vmatpush.msrb.mxu1 %v1460_v60  ;;  %v1120_v60 = vld [vmem:[#allocation2 + $0x28] sm:$0xff] }
 0x53a   :  { %1405 = vmatmul.msk.f32.gmra.mxu1 %vm38_vm0, %v1625_v9  ;;  %v1427_v9 = vld [vmem:[%s2560_s2 + $0x698] sm:$0xff] }
 0x53b   :  { %994 = vmatpush.msrb.mxu3 %v1427_v9  ;;  %1040 = vmatpush.msrb.mxu1 %v1459_v63  ;;  %v1119_v63 = vld [vmem:[#allocation2 + $0x20] sm:$0xff] }
 0x53d   :  { %995 = vmatpush.msrb.mxu3 %v1426_v41  ;;  %1041 = vmatpush.msrb.mxu1 %v1458_v5  ;;  %v1118_v5 = vld [vmem:[#allocation2 + $0x18] sm:$0xff] }
 0x53f   :  { %996 = vmatpush.msrb.mxu3 %v1425_v42  ;;  %1042 = vmatpush.msrb.mxu1 %v1457_v1  ;;  %v1072_v42 = vsub.f32 2.0, %v1053_v38 }
 0x541   :  { %997 = vmatpush.msrb.mxu3 %v1424_v43  ;;  %1043 = vmatpush.msrb.mxu1 %v1456_v6  ;;  %v1129_v43 = vld [vmem:[#allocation2 + $0x70] sm:$0xff] }
 0x542   :  { %1406 = vmatmul.msk.f32.gmra.mxu1 %vm38_vm0, %v1782_v62  ;;  %v1448_v62 = vld [vmem:[%s2560_s2 + $0x740] sm:$0xff]  ;;  %1133 = vmatpush.msrb.mxu2 %v1129_v43 }
 0x543   :  { %1012 = vmatpush.msrb.mxu0 %v1448_v62 }
 0x545   :  { %1013 = vmatpush.msrb.mxu0 %v1447_v45  ;;  %v1128_v45 = vld [vmem:[#allocation2 + $0x68] sm:$0xff] }
 0x546   :  { %1134 = vmatpush.msrb.mxu2 %v1128_v45 }
 0x548   :  { %1135 = vmatpush.msrb.mxu2 %v1127_v47 }
 0x54a   :  { %1407 = vmatmul.msk.f32.gmra.mxu1 %vm38_vm0, %v1798_v10  ;;  %v1446_v10 = vld [vmem:[%s2560_s2 + $0x730] sm:$0xff] }
 0x54b   :  { %1014 = vmatpush.msrb.mxu0 %v1446_v10 }
 0x54d   :  { %1015 = vmatpush.msrb.mxu0 %v1445_v0  ;;  %v1073_v0 = vmul.f32 %v1072_v42, %v1053_v38  ;;  %v1131_v42 = vld [vmem:[%s2561_s3 + $0x10] sm:$0x1] }
 0x54f   :  { %1016 = vmatpush.msrb.mxu0 %v1444_v48 }
 0x551   :  { %1017 = vmatpush.msrb.mxu0 %v1443_v49  ;;  %v1126_v49 = vld [vmem:[#allocation2 + $0x58] sm:$0xff] }
 0x552   :  { %1136 = vmatpush.msrb.mxu2 %v1126_v49 }
 0x553   :  { %1018 = vmatpush.msrb.mxu0 %v1442_v51 }
 0x554   :  { %1137 = vmatpush.msrb.mxu2 %v1125_v52 }
 0x555   :  { %1019 = vmatpush.msrb.mxu0 %v1441_v53 }
 0x556   :  { %1138 = vmatpush.msrb.mxu2 %v1124_v54 }
 0x557   :  { %1020 = vmatpush.msrb.mxu0 %v1440_v56  ;;  %v1123_v56 = vld [vmem:[#allocation2 + $0x40] sm:$0xff] }
 0x558   :  { %1139 = vmatpush.msrb.mxu2 %v1123_v56 }
 0x55a   :  { %1140 = vmatpush.msrb.mxu2 %v1122_v57 }
 0x55c   :  { %1141 = vmatpush.msrb.mxu2 %v1121_v59 }
 0x55e   :  { %1142 = vmatpush.msrb.mxu2 %v1120_v60 }
 0x560   :  { %1143 = vmatpush.msrb.mxu2 %v1119_v63 }
 0x562   :  { %1144 = vmatpush.msrb.mxu2 %v1118_v5 }
 0x59f   :  { %v874_v7 = vpop.f32.mrf.mxu1 }
 0x5a0   :  { %998 = vmatmul.f32.vlgmr.msrb.gmra.mxu3 %v874_v7  ;;  %v1117_v7 = vld [vmem:[#allocation2 + $0x10] sm:$0xff] }
 0x5a1   :  { %1145 = vmatpush.msrb.mxu2 %v1117_v7 }
 0x5a2   :  { %v976_v3 = vpop.f32.mrf.mxu2 }
 0x5a3   :  { %v977_v19 = vadd.f32 %v1486_v17, %v976_v3 }
 0x5a7   :  { %v877_v8 = vpop.f32.mrf.mxu1 }
 0x5a8   :  { %1001 = vmatmul.f32.gmra.mxu3 %v877_v8 }
 0x5aa   :  { %v979_v16 = vpop.f32.mrf.mxu2 }
 0x5ab   :  { %v980_v21 = vadd.f32 %v1486_v17, %v979_v16  ;;  %v1487_v16 = vld [vmem:[%s2561_s3 + $0xd] ss:$0 sm:$0xff] }
 0x5af   :  { %v880_v11 = vpop.f32.mrf.mxu1 }
 0x5b0   :  { %1021 = vmatmul.f32.vlgmr.msrb.gmra.mxu0 %v880_v11  ;;  %v1116_v11 = vld [vmem:[#allocation2 + $0x8] sm:$0xff] }
 0x5b1   :  { %1146 = vmatpush.msrb.mxu2 %v1116_v11 }
 0x5b7   :  { %v883_v12 = vpop.f32.mrf.mxu1 }
 0x5b8   :  { %1024 = vmatmul.f32.gmra.mxu0 %v883_v12 }
 0x5bf   :  { %v886_v13 = vpop.f32.mrf.mxu1 }
 0x5c0   :  { %1044 = vmatmul.f32.vlgmr.msrb.gmra.mxu1 %v886_v13 }
 0x5c7   :  { %v889_v14 = vpop.f32.mrf.mxu1 }
 0x5c8   :  { %1047 = vmatmul.f32.gmra.mxu1 %v889_v14  ;;  %v1115_v14 = vld [vmem:[#allocation2] sm:$0xff] }
 0x5c9   :  { %1147 = vmatpush.msrb.mxu2 %v1115_v14 }
 0x623   :  { %v999_v2 = vpop.f32.mrf.mxu3 }
 0x624   :  { %v1000_v22 = vadd.f32 %v999_v2, %v977_v19 }
 0x62b   :  { %v1002_v20 = vpop.f32.mrf.mxu3 }
 0x62c   :  { %v1003_v24 = vadd.f32 %v1002_v20, %v980_v21 }
 0x62d   :  { %v1022_v15 = vpop.f32.mrf.mxu0 }
 0x62e   :  { %v1023_v25 = vadd.f32 %v1022_v15, %v1000_v22 }
 0x635   :  { %v1025_v23 = vpop.f32.mrf.mxu0 }
 0x636   :  { %v1026_v26 = vadd.f32 %v1025_v23, %v1003_v24  ;;  %v1488_v23 = vld [vmem:[%s2561_s3 + $0xe] ss:$0 sm:$0xff] }
 0x63d   :  { %v1045_v18 = vpop.f32.mrf.mxu1 }
 0x63e   :  { %v2501_v61 = vadd.f32 %v1045_v18, %v1023_v25 }
 0x640   :  { %v1062_v29 = vmul.f32 %v2501_v61, %v2501_v61 }
 0x645   :  { %v1048_v27 = vpop.f32.mrf.mxu1 }
 0x646   :  { %v2503_v28 = vadd.f32 %v1048_v27, %v1026_v26  ;;  %v1511_v27 = vld [vmem:[%s2559_s1 + $0x8] sm:$0xff] }
 0x648   :  { %v1054_v30 = vadd.f32 %v2503_v28, %v2501_v61  ;;  %v1063_v31 = vmul.f32 %v2503_v28, %v2503_v28 }
 0x64a   :  { %v1055_v32 = vrot.slane %v1054_v30, 4  ;;  %v1064_v33 = vadd.f32 %v1063_v31, %v1062_v29  ;;  %v1512_v29 = vld [vmem:[%s2559_s1] sm:$0xff] }
 0x64c   :  { %v1056_v34 = vadd.f32 %v1055_v32, %v1054_v30  ;;  %v1065_v4 = vrot.slane %v1064_v33, 4 }
 0x64e   :  { %v1057_v36 = vrot.slane %v1056_v34, 2  ;;  %v1066_v37 = vadd.f32 %v1065_v4, %v1064_v33 }
 0x650   :  { %v1058_v35 = vadd.f32 %v1057_v36, %v1056_v34  ;;  %v1067_v39 = vrot.slane %v1066_v37, 2 }
 0x652   :  { %v1059_v9 = vrot.slane %v1058_v35, 1  ;;  %v1068_v41 = vadd.f32 %v1067_v39, %v1066_v37 }
 0x654   :  { %v1060_v62 = vadd.f32 %v1059_v9, %v1058_v35  ;;  %v1069_v44 = vrot.slane %v1068_v41, 1  ;;  %v1152_v9 = vlaneseq }
 0x656   :  { %v1061_v10 = vmul.f32 0.0625, %v1060_v62  ;;  %v1070_v46 = vadd.f32 %v1069_v44, %v1068_v41  ;;  %v1153_v41 = vand.u32 127, %v1152_v9 }
 0x658   :  { %v1074_v48 = vmul.f32 %v1061_v10, %v1061_v10  ;;  %v1071_v50 = vmul.f32 0.0625, %v1070_v46  ;;  %v1078_v6 = vmul.f32 %v1061_v10, %v1053_v38  ;;  %vm1215_vm3 = vcmp.ge.s32.totalorder %v1153_v41, 8 }
 0x659   :  { %vm1216_vm4 = vcmp.lt.s32.totalorder %v1153_v41, 12  ;;  %vm1155_vm6 = vcmp.lt.s32.totalorder %v1153_v41, 4  ;;  %vm1185_vm8 = vcmp.ge.s32.totalorder %v1153_v41, 4  ;;  %vm1186_vm9 = vcmp.lt.s32.totalorder %v1153_v41, 8 }
 0x65a   :  { %v1075_v51 = vmul.f32 %v1074_v48, %v1073_v0  ;;  %v1079_v13 = vperm.slane %v1078_v6, 0  ;;  %vm2531_vm5 = vmand %vm1215_vm3, %vm1216_vm4 }
 0x65b   :  { %vm2540_vm10 = vmand %vm1185_vm8, %vm1186_vm9 }
 0x65c   :  { %v1076_v53 = vsub.f32 %v1071_v50, %v1075_v51  ;;  %v1080_v15 = vsub.f32 %v2501_v61, %v1079_v13  ;;  %v1081_v17 = vsub.f32 %v2503_v28, %v1079_v13 }
 0x65e   :  { %v1077_v55 = vmax.f32 %v1076_v53, 0.0  ;;  %v1083_v20 = vmul.f32 %v1487_v16, %v1080_v15  ;;  %v1084_v21 = vmul.f32 %v1487_v16, %v1081_v17 }
 0x660   :  { %v1085_v58 = vadd.f32 1e-05, %v1077_v55 }
 0x662   :  { %1495 = vrsqrt.f32 %v1085_v58  ;;  %vm1092_vm1 = vweird.f32 %v1085_v58 }
 0x668   :  { %v1496_v1 = vpop.eup %1495 }
 0x669   :  { %v1087_v8 = vmul.f32 %v1496_v1, %v1085_v58  ;;  %vm1093_vm0 = vweird.f32 %v1496_v1 }
 0x66a   :  { %vm1094_vm2 = vmor %vm1092_vm1, %vm1093_vm0 }
 0x66b   :  { %v1088_v12 = vmul.f32 %v1496_v1, %v1087_v8 }
 0x66d   :  { %v1089_v3 = vmul.f32 0.5, %v1088_v12 }
 0x66f   :  { %v1090_v2 = vsub.f32 1.5, %v1089_v3 }
 0x671   :  { %v1091_v18 = vmul.f32 %v1496_v1, %v1090_v2 }
 0x673   :  { %v1095_v19 = vsel %vm1094_vm2, %v1496_v1, %v1091_v18 }
 0x674   :  { %v1096_v22 = vperm.slane %v1095_v19, 0 }
 0x676   :  { %v1097_v24 = vmul.f32 %v1096_v22, %v1083_v20  ;;  %v1098_v25 = vmul.f32 %v1096_v22, %v1084_v21 }
 0x678   :  { %v1100_v26 = vadd.f32 %v1488_v23, %v1097_v24  ;;  %v1101_v61 = vadd.f32 %v1488_v23, %v1098_v25 }
 0x67a   :  { %v1103_v28 = vadd.f32 %v1511_v27, %v1101_v61  ;;  %v1102_v30 = vadd.f32 %v1512_v29, %v1100_v26 }
 0x67c   :  { %v1105_v31 = vmax.f32 %v1103_v28, 0.0  ;;  %v1104_v32 = vmax.f32 %v1102_v30, 0.0 }
 0x67e   :  { %v1106_v33 = vadd.f32 %v1105_v31, %v1104_v32 }
 0x680   :  { %v1107_v34 = vrot.slane %v1106_v33, 4 }
 0x682   :  { %v1108_v4 = vadd.f32 %v1107_v34, %v1106_v33 }
 0x684   :  { %v1109_v36 = vrot.slane %v1108_v4, 2 }
 0x686   :  { %v1110_v37 = vadd.f32 %v1109_v36, %v1108_v4 }
 0x688   :  { %v1111_v38 = vrot.slane %v1110_v37, 1 }
 0x68a   :  { %v1112_v35 = vadd.f32 %v1111_v38, %v1110_v37 }
 0x68c   :  { %v1113_v39 = vmul.f32 0.0625, %v1112_v35 }
 0x68e   :  { %v1114_v40 = vmax.f32 %v1113_v39, 0.0 }
 0x690   :  { %1148 = vmatmul.f32.vlgmr.msrb.gmra.mxu2 %v1114_v40 }
 0x713   :  { %v1149_v43 = vpop.f32.mrf.mxu2 }
 0x714   :  { %v1150_v44 = vadd.f32 %v1149_v43, %v1131_v42 }
 0x716   :  { %v1218_v45 = vsel %vm2531_vm5, %v1150_v44, -inf  ;;  %v1157_v10 = vsel %vm1155_vm6, %v1150_v44, -inf  ;;  %v1188_v48 = vsel %vm2540_vm10, %v1150_v44, -inf }
 0x717   :  { %v1219_v46 = vsel %vm1158_vm7, %v1218_v45, -inf  ;;  %v1159_v0 = vsel %vm1158_vm7, %v1157_v10, -inf  ;;  %v1189_v49 = vsel %vm1158_vm7, %v1188_v48, -inf }
 0x718   :  { %1220 = vmax.xlane.f32.xlu1 %v1219_v46  ;;  %1160 = vmax.xlane.f32.xlu0 %v1159_v0 }
 0x720   :  { %1190 = vmax.xlane.f32.xlu0 %v1189_v49 }
 0x78b   :  { %v1161_v50 = vpop.xlane.xlu0 %1160  ;;  %v1221_v53 = vpop.xlane.xlu1 %1220 }
 0x78c   :  { %v1162_v51 = vsub.f32 %v1150_v44, %v1161_v50  ;;  %v1222_v56 = vsub.f32 %v1150_v44, %v1221_v53 }
 0x78e   :  { %v1163_v52 = vmul.f32 1.442695, %v1162_v51  ;;  %v1223_v59 = vmul.f32 1.442695, %v1222_v56 }
 0x790   :  { %1497 = vpow2.f32 %v1163_v52 }
 0x793   :  { %v1191_v54 = vpop.xlane.xlu0 %1190 }
 0x794   :  { %v1192_v55 = vsub.f32 %v1150_v44, %v1191_v54 }
 0x796   :  { %v1193_v57 = vmul.f32 1.442695, %v1192_v55  ;;  %v1498_v58 = vpop.eup %1497 }
 0x797   :  { %v1165_v60 = vsel %vm1155_vm6, %v1498_v58, 0.0 }
 0x798   :  { %1499 = vpow2.f32 %v1193_v57  ;;  %v1166_v63 = vsel %vm1158_vm7, %v1165_v60, 0.0 }
 0x799   :  { %1167 = vadd.xlane.f32.xlu1 %v1166_v63  ;;  %1501 = vpow2.f32 %v1223_v59 }
 0x79e   :  { %v1500_v5 = vpop.eup %1499 }
 0x79f   :  { %v1195_v1 = vsel %vm2540_vm10, %v1500_v5, 0.0  ;;  %v1502_v7 = vpop.eup %1501 }
 0x7a0   :  { %v1196_v6 = vsel %vm1158_vm7, %v1195_v1, 0.0  ;;  %v1225_v8 = vsel %vm2531_vm5, %v1502_v7, 0.0 }
 0x7a1   :  { %1197 = vadd.xlane.f32.xlu2 %v1196_v6  ;;  %v1226_v11 = vsel %vm1158_vm7, %v1225_v8, 0.0  ;;  %vm1245_vm7 = vcmask 90112  }
 0x7a9   :  { %1227 = vadd.xlane.f32.xlu2 %v1226_v11 }
 0x80c   :  { %v1168_v12 = vpop.xlane.xlu1 %1167 }
 0x80d   :  { %1503 = vrcp.f32 %v1168_v12  ;;  %v1180_v26 = vand.u32 2147483648, %v1168_v12  ;;  %vm1174_vm15 = vweird.f32 %v1168_v12  ;;  %v1178_v61 = vand.u32 2147483647, %v1168_v12 }
 0x80f   :  { %v1181_v32 = vor.u32 1.1754944e-38, %v1180_v26  ;;  %vm1179_vm2 = vcmp.eq.f32.partialorder %v1178_v61, 8.507059e+37 }
 0x813   :  { %v1504_v13 = vpop.eup %1503 }
 0x814   :  { %v1198_v14 = vpop.xlane.xlu2 %1197  ;;  %v1170_v3 = vmul.f32 %v1504_v13, %v1168_v12  ;;  %vm1175_vm12 = vweird.f32 %v1504_v13 }
 0x815   :  { %1505 = vrcp.f32 %v1198_v14  ;;  %v1210_v21 = vand.u32 2147483648, %v1198_v14  ;;  %vm1204_vm13 = vweird.f32 %v1198_v14  ;;  %v1208_v24 = vand.u32 2147483647, %v1198_v14  ;;  %vm1176_vm0 = vmor %vm1174_vm15, %vm1175_vm12 }
 0x816   :  { %v1171_v2 = vsub.f32 1.0, %v1170_v3 }
 0x817   :  { %v1211_v29 = vor.u32 1.1754944e-38, %v1210_v21  ;;  %vm1209_vm1 = vcmp.eq.f32.partialorder %v1208_v24, 8.507059e+37 }
 0x818   :  { %v1172_v18 = vmul.f32 %v1504_v13, %v1171_v2 }
 0x81a   :  { %v1173_v22 = vadd.f32 %v1504_v13, %v1172_v18 }
 0x81b   :  { %v1506_v15 = vpop.eup %1505 }
 0x81c   :  { %v1200_v17 = vmul.f32 %v1506_v15, %v1198_v14  ;;  %v1228_v16 = vpop.xlane.xlu2 %1227  ;;  %vm1205_vm11 = vweird.f32 %v1506_v15  ;;  %v1177_v30 = vsel %vm1176_vm0, %v1504_v13, %v1173_v22 }
 0x81d   :  { %1507 = vrcp.f32 %v1228_v16  ;;  %vm1206_vm14 = vmor %vm1204_vm13, %vm1205_vm11  ;;  %v1240_v34 = vand.u32 2147483648, %v1228_v16  ;;  %v1238_v36 = vand.u32 2147483647, %v1228_v16  ;;  %v1182_v37 = vsel %vm1179_vm2, %v1181_v32, %v1177_v30 }
 0x81e   :  { %v1201_v19 = vsub.f32 1.0, %v1200_v17  ;;  %vm1234_vm4 = vweird.f32 %v1228_v16  ;;  %v1183_v40 = vmul.f32 %v1182_v37, %v1165_v60 }
 0x81f   :  { %v1241_v39 = vor.u32 1.1754944e-38, %v1240_v34  ;;  %vm1239_vm6 = vcmp.eq.f32.partialorder %v1238_v36, 8.507059e+37 }
 0x820   :  { %v1202_v20 = vmul.f32 %v1506_v15, %v1201_v19 }
 0x822   :  { %v1203_v23 = vadd.f32 %v1506_v15, %v1202_v20 }
 0x823   :  { %v1508_v25 = vpop.eup %1507 }
 0x824   :  { %v1207_v27 = vsel %vm1206_vm14, %v1506_v15, %v1203_v23  ;;  %v1230_v28 = vmul.f32 %v1508_v25, %v1228_v16  ;;  %vm1235_vm3 = vweird.f32 %v1508_v25 }
 0x825   :  { %v1212_v33 = vsel %vm1209_vm1, %v1211_v29, %v1207_v27  ;;  %vm1236_vm5 = vmor %vm1234_vm4, %vm1235_vm3 }
 0x826   :  { %v1231_v31 = vsub.f32 1.0, %v1230_v28  ;;  %v1213_v38 = vmul.f32 %v1212_v33, %v1195_v1 }
 0x828   :  { %v1232_v4 = vmul.f32 %v1508_v25, %v1231_v31  ;;  %v1214_v42 = vadd.f32 %v1213_v38, %v1183_v40 }
 0x82a   :  { %v1233_v35 = vadd.f32 %v1508_v25, %v1232_v4 }
 0x82c   :  { %v1237_v9 = vsel %vm1236_vm5, %v1508_v25, %v1233_v35 }
 0x82d   :  { %v1242_v41 = vsel %vm1239_vm6, %v1241_v39, %v1237_v9 }
 0x82e   :  { %v1243_v43 = vmul.f32 %v1242_v41, %v1225_v8 }
 0x830   :  { %v1244_v62 = vadd.f32 %v1243_v43, %v1214_v42 }
 0x832   :  { %1246 = vst.msk [vmem:[%s2563_s5] sm:$0x1] %vm1245_vm7, %v1244_v62 }
 0x833   :  { %1251 = vsyncpa [#allocation3], 1 }

</bundles_post_ra>
